<compile_context>
chip_gen: v5e
topology: v5e:2x2
jax: 0.10.0
libtpu: 0.0.40
codegen_flags: <defaults>
</compile_context>

<pallas_src>
import jax
import jax.numpy as jnp
from jax.experimental import pallas as pl
from jax.experimental.pallas import tpu as pltpu

IN_DIM = 768
HID_DIM = 512
OUT_DIM = 13
OUT_PAD = 128           # lane-dense padded output width
NEG_INF = -1e30         # fill for padded logit lanes (never wins max, exp ~ 0)


def _round_up(x, m):
    return (x + m - 1) // m * m


def head_kernel(x_ref, w1_ref, b1_ref, w2_ref, b2_ref, o_ref):
    # x_ref:  [TB, 768] bf16     w1_ref: [768, 512] bf16    b1_ref: [1, 512] f32
    # w2_ref: [512, 128] bf16    b2_ref: [1, 128] f32       o_ref:  [TB, 128]
    x = x_ref[...]

    # fc1 (bf16 MXU matmul, f32 accumulate) + bias + ReLU.
    # dropout(p=0.1) is identity at inference.
    h = jnp.dot(x, w1_ref[...], preferred_element_type=jnp.float32) + b1_ref[...]
    h = jnp.maximum(h, 0.0)

    # fc3 also in bf16 on the MXU (f32 accumulate, f32 bias). Padded weight
    # columns are zero and padded bias lanes are NEG_INF, so the 13 real
    # log-probs are unaffected by the 115 padding lanes.
    logits = jnp.dot(h.astype(jnp.bfloat16), w2_ref[...],
                     preferred_element_type=jnp.float32) + b2_ref[...]

    # LogSoftmax over the full 128 lanes (numerically stable, unmasked reduce).
    m = jnp.max(logits, axis=1, keepdims=True)
    z = logits - m
    lse = jnp.log(jnp.sum(jnp.exp(z), axis=1, keepdims=True))
    o_ref[...] = (z - lse).astype(o_ref.dtype)


def prepare_head_params(w1, b1, w2, b2):
    """One-time weight prep (casts / lane padding). Call once, reuse every step,
    so per-call wrappers carry no extra XLA launches or HBM churn."""
    w1_bf = jnp.asarray(w1).astype(jnp.bfloat16)
    b1_2d = jnp.asarray(b1, jnp.float32).reshape(1, HID_DIM)
    w2_p = jnp.zeros((HID_DIM, OUT_PAD), jnp.bfloat16).at[:, :OUT_DIM].set(
        jnp.asarray(w2).astype(jnp.bfloat16))
    b2_p = jnp.full((1, OUT_PAD), NEG_INF, jnp.float32).at[0, :OUT_DIM].set(
        jnp.asarray(b2, jnp.float32).reshape(-1))
    return w1_bf, b1_2d, w2_p, b2_p


def arch_head(cls_hs, w1_bf, b1_2d, w2_p, b2_p, *, tb=1024, out_dtype=jnp.float32):
    """cls_hs: [B, 768] f32; remaining args from prepare_head_params().
    Returns [B, 13] log-probabilities."""
    B = cls_hs.shape[0]

    # Single bf16 cast (halves activation DMA) + minimal pad to a multiple of
    # 16 rows (bf16 sublane packing). No full-tile zero pad: the grid uses
    # pl.cdiv, and any garbage rows in a partial last tile are independent and
    # sliced off by the wrapper (never reduced across batch in-kernel).
    B16 = _round_up(B, 16)
    x = cls_hs.astype(jnp.bfloat16)
    if B16 != B:
        x = jnp.pad(x, ((0, B16 - B), (0, 0)))

    # Batch tile: 16-aligned, capped at half the padded batch so the
    # "parallel" batch axis gives >=2 grid steps (shards across v7x's 2 TCs).
    # tb=1024 keeps the double-buffered footprint (~6 MiB) well under the
    # default scoped VMEM on v5e/v6e/v7x.
    tb = max(16, min(tb, _round_up(pl.cdiv(B16, 2), 16)))
    grid = (pl.cdiv(B16, tb),)

    cost = pl.CostEstimate(
        flops=2 * B16 * (IN_DIM * HID_DIM + HID_DIM * OUT_PAD),
        transcendentals=B16 * OUT_PAD,
        bytes_accessed=(x.size * 2 + w1_bf.size * 2 + b1_2d.size * 4
                        + w2_p.size * 2 + b2_p.size * 4
                        + B16 * OUT_PAD * jnp.dtype(out_dtype).itemsize),
    )

    out = pl.pallas_call(
        head_kernel,
        out_shape=jax.ShapeDtypeStruct((B16, OUT_PAD), out_dtype),
        grid_spec=pl.GridSpec(
            grid=grid,
            in_specs=[
                pl.BlockSpec((tb, IN_DIM), lambda i: (i, 0)),        # x tiles
                pl.BlockSpec((IN_DIM, HID_DIM), lambda i: (0, 0)),   # w1 resident
                pl.BlockSpec((1, HID_DIM), lambda i: (0, 0)),        # b1 resident
                pl.BlockSpec((HID_DIM, OUT_PAD), lambda i: (0, 0)),  # w2 resident
                pl.BlockSpec((1, OUT_PAD), lambda i: (0, 0)),        # b2 resident
            ],
            out_specs=pl.BlockSpec((tb, OUT_PAD), lambda i: (i, 0)),
        ),
        compiler_params=pltpu.CompilerParams(
            dimension_semantics=("parallel",)),
        cost_estimate=cost,
    )(x, w1_bf, b1_2d, w2_p, b2_p)

    return out[:B, :OUT_DIM]


def init_params(key):
    """Deterministic parameter init mimicking nn.Linear defaults (uniform)."""
    k1, k2, k3, k4 = jax.random.split(key, 4)
    lim1 = 1.0 / jnp.sqrt(IN_DIM)
    lim2 = 1.0 / jnp.sqrt(HID_DIM)
    w1 = jax.random.uniform(k1, (IN_DIM, HID_DIM), jnp.float32, -lim1, lim1)
    b1 = jax.random.uniform(k2, (1, HID_DIM), jnp.float32, -lim1, lim1)
    w2 = jax.random.uniform(k3, (HID_DIM, OUT_DIM), jnp.float32, -lim2, lim2)
    b2 = jax.random.uniform(k4, (1, OUT_DIM), jnp.float32, -lim2, lim2)
    return w1, b1, w2, b2


def reference_matched(cls_hs, w1, b1, w2, b2):
    """Matches the kernel's numerics (bf16 inputs to both GEMMs, f32 accum)."""
    xb = cls_hs.astype(jnp.bfloat16)
    w1b = w1.astype(jnp.bfloat16)
    h = jnp.dot(xb, w1b, preferred_element_type=jnp.float32) + b1.reshape(1, -1)
    h = jnp.maximum(h, 0.0)
    logits = jnp.dot(h.astype(jnp.bfloat16), w2.astype(jnp.bfloat16),
                     preferred_element_type=jnp.float32) + b2.reshape(1, -1)
    return jax.nn.log_softmax(logits, axis=1)


def reference_f32(cls_hs, w1, b1, w2, b2):
    h = jnp.maximum(cls_hs @ w1 + b1.reshape(1, -1), 0.0)
    logits = h @ w2 + b2.reshape(1, -1)
    return jax.nn.log_softmax(logits, axis=1)


if __name__ == "__main__":
    key = jax.random.PRNGKey(0)
    k_x, k_p = jax.random.split(key)

    B = 2  # small batch; stand-in for BERT pooled output cls_hs
    cls_hs = jax.random.normal(k_x, (B, IN_DIM), jnp.float32)
    w1, b1, w2, b2 = init_params(k_p)

    # One-time parameter prep (outside the per-call path).
    w1_bf, b1_2d, w2_p, b2_p = prepare_head_params(w1, b1, w2, b2)

    out = arch_head(cls_hs, w1_bf, b1_2d, w2_p, b2_p)
    out = jax.block_until_ready(out)
    assert out.shape == (B, OUT_DIM)
    assert bool(jnp.all(jnp.isfinite(out)))

    ref_bf = reference_matched(cls_hs, w1, b1, w2, b2)
    assert jnp.allclose(out, ref_bf, atol=2e-3, rtol=2e-3), \
        "mismatch vs bf16-matched reference"

    ref_f32 = reference_f32(cls_hs, w1, b1, w2, b2)
    assert jnp.allclose(out, ref_f32, atol=5e-2, rtol=5e-2), \
        "mismatch vs f32 reference (beyond bf16 tolerance)"

    print("KERNEL_OK")
</pallas_src>

<mosaic_0001>
module attributes {stable_mosaic.version = 11 : i64} {
  func.func @head_kernel(%arg0: i32, %arg1: memref<16x768xbf16, #tpu.memory_space<vmem>>, %arg2: memref<768x512xbf16, #tpu.memory_space<vmem>>, %arg3: memref<1x512xf32, #tpu.memory_space<vmem>>, %arg4: memref<512x128xbf16, #tpu.memory_space<vmem>>, %arg5: memref<1x128xf32, #tpu.memory_space<vmem>>, %arg6: memref<16x128xf32, #tpu.memory_space<vmem>>) attributes {dimension_semantics = [#tpu.dimension_semantics<parallel>], iteration_bounds = array<i64: 1>, scalar_prefetch = 0 : i64, scratch_operands = 0 : i64, tpu.core_type = #tpu.core_type<tc>, window_params = [{transform_indices = @transform_0, window_bounds = array<i64: 16, 768>}, {pipeline_mode = #tpu.pipeline_mode<synchronous>, transform_indices = @transform_1, window_bounds = array<i64: 768, 512>}, {pipeline_mode = #tpu.pipeline_mode<synchronous>, transform_indices = @transform_2, window_bounds = array<i64: 1, 512>}, {pipeline_mode = #tpu.pipeline_mode<synchronous>, transform_indices = @transform_3, window_bounds = array<i64: 512, 128>}, {pipeline_mode = #tpu.pipeline_mode<synchronous>, transform_indices = @transform_4, window_bounds = array<i64: 1, 128>}, {transform_indices = @transform_5, window_bounds = array<i64: 16, 128>}]} {
    %c0 = arith.constant 0 : index
    %c0_0 = arith.constant 0 : index
    %0 = vector.load %arg1[%c0, %c0_0] : memref<16x768xbf16, #tpu.memory_space<vmem>>, vector<16x768xbf16>
    %c0_1 = arith.constant 0 : index
    %c0_2 = arith.constant 0 : index
    %1 = vector.load %arg2[%c0_1, %c0_2] : memref<768x512xbf16, #tpu.memory_space<vmem>>, vector<768x512xbf16>
    %cst = arith.constant dense<0.000000e+00> : vector<16x512xf32>
    %2 = tpu.matmul %0, %1, %cst {dimension_numbers = #tpu.dot_dimension_numbers<[1], [0], [0], [1], [0, 0, 1, 1], [], []>} : vector<16x768xbf16>, vector<768x512xbf16>, vector<16x512xf32> -> vector<16x512xf32>
    %c0_3 = arith.constant 0 : index
    %c0_4 = arith.constant 0 : index
    %3 = vector.load %arg3[%c0_3, %c0_4] : memref<1x512xf32, #tpu.memory_space<vmem>>, vector<1x512xf32>
    %4 = vector.broadcast %3 : vector<1x512xf32> to vector<16x512xf32>
    %5 = arith.addf %2, %4 : vector<16x512xf32>
    %cst_5 = arith.constant 0.000000e+00 : f32
    %6 = vector.broadcast %cst_5 : f32 to vector<16x512xf32>
    %7 = arith.maximumf %5, %6 : vector<16x512xf32>
    %8 = arith.truncf %7 : vector<16x512xf32> to vector<16x512xbf16>
    %c0_6 = arith.constant 0 : index
    %c0_7 = arith.constant 0 : index
    %9 = vector.load %arg4[%c0_6, %c0_7] : memref<512x128xbf16, #tpu.memory_space<vmem>>, vector<512x128xbf16>
    %cst_8 = arith.constant dense<0.000000e+00> : vector<16x128xf32>
    %10 = tpu.matmul %8, %9, %cst_8 {dimension_numbers = #tpu.dot_dimension_numbers<[1], [0], [0], [1], [0, 0, 1, 1], [], []>} : vector<16x512xbf16>, vector<512x128xbf16>, vector<16x128xf32> -> vector<16x128xf32>
    %c0_9 = arith.constant 0 : index
    %c0_10 = arith.constant 0 : index
    %11 = vector.load %arg5[%c0_9, %c0_10] : memref<1x128xf32, #tpu.memory_space<vmem>>, vector<1x128xf32>
    %12 = vector.broadcast %11 : vector<1x128xf32> to vector<16x128xf32>
    %13 = arith.addf %10, %12 : vector<16x128xf32>
    %cst_11 = arith.constant dense<0xFF800000> : vector<16xf32>
    %14 = vector.multi_reduction <maximumf>, %13, %cst_11 [1] : vector<16x128xf32> to vector<16xf32>
    %15 = vector.shape_cast %14 : vector<16xf32> to vector<16x1xf32>
    %16 = vector.broadcast %15 : vector<16x1xf32> to vector<16x128xf32>
    %17 = arith.subf %13, %16 : vector<16x128xf32>
    %18 = math.exp %17 : vector<16x128xf32>
    %cst_12 = arith.constant dense<0.000000e+00> : vector<16xf32>
    %19 = vector.multi_reduction <add>, %18, %cst_12 [1] : vector<16x128xf32> to vector<16xf32>
    %20 = vector.shape_cast %19 : vector<16xf32> to vector<16x1xf32>
    %21 = math.log %20 : vector<16x1xf32>
    %22 = vector.broadcast %21 : vector<16x1xf32> to vector<16x128xf32>
    %23 = arith.subf %17, %22 : vector<16x128xf32>
    %c0_13 = arith.constant 0 : index
    %c0_14 = arith.constant 0 : index
    %24 = vector.load %arg6[%c0_13, %c0_14] : memref<16x128xf32, #tpu.memory_space<vmem>>, vector<16x128xf32>
    tpu.vector_store %arg6[%c0_13, %c0_14], %23 {strides = array<i32>} : memref<16x128xf32, #tpu.memory_space<vmem>>, vector<16x128xf32>,
    return
  }
  func.func @transform_0(%arg0: i32) -> (i32, i32) {
    %c0_i32 = arith.constant 0 : i32
    %c0_i32_0 = arith.constant 0 : i32
    return %arg0, %c0_i32 : i32, i32
  }
  func.func @transform_1(%arg0: i32) -> (i32, i32) {
    %c0_i32 = arith.constant 0 : i32
    %c0_i32_0 = arith.constant 0 : i32
    %c0_i32_1 = arith.constant 0 : i32
    return %c0_i32, %c0_i32_0 : i32, i32
  }
  func.func @transform_2(%arg0: i32) -> (i32, i32) {
    %c0_i32 = arith.constant 0 : i32
    %c0_i32_0 = arith.constant 0 : i32
    %c0_i32_1 = arith.constant 0 : i32
    return %c0_i32, %c0_i32_0 : i32, i32
  }
  func.func @transform_3(%arg0: i32) -> (i32, i32) {
    %c0_i32 = arith.constant 0 : i32
    %c0_i32_0 = arith.constant 0 : i32
    %c0_i32_1 = arith.constant 0 : i32
    return %c0_i32, %c0_i32_0 : i32, i32
  }
  func.func @transform_4(%arg0: i32) -> (i32, i32) {
    %c0_i32 = arith.constant 0 : i32
    %c0_i32_0 = arith.constant 0 : i32
    %c0_i32_1 = arith.constant 0 : i32
    return %c0_i32, %c0_i32_0 : i32, i32
  }
  func.func @transform_5(%arg0: i32) -> (i32, i32) {
    %c0_i32 = arith.constant 0 : i32
    %c0_i32_0 = arith.constant 0 : i32
    return %arg0, %c0_i32 : i32, i32
  }
}

</mosaic_0001>

<bundles_post_ra>
// kernel: tpu_custom_call.1
= control target key start
LH: loop header
LB: loop body
LE: loop exit
PB: predicated region body
PF: predicated region fallthrough
CT: control target
= control target key end

     0   :  { %10 = vsyncpa [#allocation3], 0  ;;  %s3390_s0 = inlined_call_operand.hbm [shape: bf16[16,768], index: 0, kind: input, shape index: {}]   ;;  %s3391_s1 = inlined_call_operand.hbm [shape: bf16[768,512], index: 1, kind: input, shape index: {}]   ;;  %s3392_s2 = inlined_call_operand.hbm [shape: f32[1,512], index: 2, kind: input, shape index: {}]   ;;  %s3393_s3 = inlined_call_operand.hbm [shape: bf16[512,128], index: 3, kind: input, shape index: {}]   ;;  %s3394_s4 = inlined_call_operand.vmem [shape: f32[1,128], index: 4, kind: input, shape index: {}]   ;;  %s3395_s5 = inlined_call_operand.hbm [shape: f32[16,128], index: 5, kind: output, shape index: {}]  }
   0x1   :  { %11 = vsyncpa [#allocation6], 0 }
   0x2   :  { %12 = vsyncpa [#allocation9], 0  ;;  %s31_s20 = sshll.u32 %s3391_s1, 4  ;;  %s32_s20 = int_to_ptr.hbm [resolvable:$true] %s31_s20 }
   0x3   :  { %13 = vsyncpa [#allocation4], 0  ;;  %s3287_s21 = smov [#allocation5]   ;;  %s18_s25 = sshll.u32 %s3390_s0, 4  ;;  %s19_s25 = int_to_ptr.hbm [resolvable:$true] %s18_s25 }
   0x4   :  { %s33_s22 = sshll.u32 %s3287_s21, 4  ;;  %s3288_s26 = smov 256   ;;  %s34_s22 = int_to_ptr.vmem [resolvable:$true] %s33_s22 }
   0x5   :  { %s3289_s27 = smov 16   ;;  %s3290_s28 = smov [#allocation2]  }
   0x6   :  { %39 = dma.hbm_to_vmem [thread:$0]  %s32_s20, 24576, %s34_s22, [#allocation6], %s3288_s26, %s3288_s26, %s3289_s27  }
   0x7   :  { %s20_s29 = sshll.u32 %s3290_s28, 4  ;;  %s3291_s30 = smov 384   ;;  %s21_s29 = int_to_ptr.vmem [resolvable:$true] %s20_s29 }
   0x8   :  { %s3292_s6 = smov 24   ;;  %s45_s8 = sshll.u32 %s3392_s2, 4  ;;  %s46_s8 = int_to_ptr.hbm [resolvable:$true] %s45_s8 }
   0x9   :  { %26 = dma.hbm_to_vmem [thread:$0]  %s19_s25, 768, %s21_s29, [#allocation3], %s3291_s30, %s3291_s30, %s3292_s6  }
   0xa   :  { %s3293_s9 = smov [#allocation7]   ;;  %s55_s12 = sshll.u32 %s3393_s3, 4  ;;  %s56_s12 = int_to_ptr.hbm [resolvable:$true] %s55_s12 }
   0xb   :  { %s47_s10 = sshll.u32 %s3293_s9, 4  ;;  %s3294_s13 = smov [#allocation8]   ;;  %s48_s10 = int_to_ptr.vmem [resolvable:$true] %s47_s10 }
   0xc   :  { %50 = dma.hbm_to_vmem [thread:$0]  %s46_s8, 64, %s48_s10, [#allocation6]  }
   0xd   :  { %s57_s14 = sshll.u32 %s3294_s13, 4  ;;  %s3295_s15 = smov 64   ;;  %s58_s14 = int_to_ptr.vmem [resolvable:$true] %s57_s14 }
   0xe   :  { %s3296_s16 = smov 4  }
   0xf   :  { %63 = dma.hbm_to_vmem [thread:$0]  %s56_s12, 4096, %s58_s14, [#allocation9], %s3295_s15, %s3295_s15, %s3296_s16  }
  0x10   :  { %3279 = dma.done.wait [#allocation3], 768  }
  0x11   :  { %3280 = vsyncadd [#allocation3], 4294966528 }
  0x12   :  { %3281 = dma.done.wait [#allocation6], 24640  }
  0x13   :  { %3282 = vsyncadd [#allocation6], 4294942656 }
  0x14   :  { %3283 = dma.done.wait [#allocation9], 4096  }
  0x15   :  { %3284 = vsyncadd [#allocation9], 4294963200  ;;  %v2125_v0 = vld [vmem:[#allocation5 + $0xe0] sm:$0xf]  ;;  %v2943_v1 = vld [vmem:[#allocation5 + $0xec] sm:$0xf0] }
  0x16   :  { %v2253_v2 = vld [vmem:[#allocation5 + $0x1e0] sm:$0xf]  ;;  %v2126_v3 = vor.u32 %v2943_v1, %v2125_v0  ;;  %v2975_v4 = vld [vmem:[#allocation5 + $0x1ec] sm:$0xf0]  ;;  %s1972_s20 = sshll.u32 %s3395_s5, 4  ;;  %s3298_s21 = smov 128   ;;  %s1973_s20 = int_to_ptr.hbm [resolvable:$true] %s1972_s20 }
  0x17   :  { %v2381_v5 = vld [vmem:[#allocation5 + $0x2e0] sm:$0xf]  ;;  %v3007_v6 = vld [vmem:[#allocation5 + $0x2ec] sm:$0xf0]  ;;  %v2254_v7 = vor.u32 %v2975_v4, %v2253_v2  ;;  %s3299_s22 = smov 8  }
  0x18   :  { %v2382_v8 = vor.u32 %v3007_v6, %v2381_v5  ;;  %v2509_v9 = vld [vmem:[#allocation5 + $0x3e0] sm:$0xf]  ;;  %v3039_v10 = vld [vmem:[#allocation5 + $0x3ec] sm:$0xf0]  ;;  %1280 = vmatpush.bf16.msra.mxu0 %v2126_v3 }
  0x19   :  { %v2109_v11 = vld [vmem:[#allocation5 + $0xc0] sm:$0xf]  ;;  %v2510_v12 = vor.u32 %v3039_v10, %v2509_v9  ;;  %v2939_v13 = vld [vmem:[#allocation5 + $0xcc] sm:$0xf0]  ;;  %1294 = vmatpush.bf16.msra.mxu1 %v2254_v7 }
  0x1a   :  { %v2237_v14 = vld [vmem:[#allocation5 + $0x1c0] sm:$0xf]  ;;  %v2971_v15 = vld [vmem:[#allocation5 + $0x1cc] sm:$0xf0]  ;;  %1308 = vmatpush.bf16.msra.mxu2 %v2382_v8  ;;  %v2110_v16 = vor.u32 %v2939_v13, %v2109_v11 }
  0x1b   :  { %v2238_v17 = vor.u32 %v2971_v15, %v2237_v14  ;;  %v2365_v18 = vld [vmem:[#allocation5 + $0x2c0] sm:$0xf]  ;;  %v3003_v19 = vld [vmem:[#allocation5 + $0x2cc] sm:$0xf0]  ;;  %1322 = vmatpush.bf16.msra.mxu3 %v2510_v12 }
  0x1c   :  { %v2493_v20 = vld [vmem:[#allocation5 + $0x3c0] sm:$0xf]  ;;  %v2366_v21 = vor.u32 %v3003_v19, %v2365_v18  ;;  %v3035_v22 = vld [vmem:[#allocation5 + $0x3cc] sm:$0xf0]  ;;  %1281 = vmatpush.bf16.msra.mxu0 %v2110_v16 }
  0x1d   :  { %v2093_v23 = vld [vmem:[#allocation5 + $0xa0] sm:$0xf]  ;;  %v2935_v24 = vld [vmem:[#allocation5 + $0xac] sm:$0xf0]  ;;  %v2494_v25 = vor.u32 %v3035_v22, %v2493_v20  ;;  %1295 = vmatpush.bf16.msra.mxu1 %v2238_v17 }
  0x1e   :  { %v2221_v26 = vld [vmem:[#allocation5 + $0x1a0] sm:$0xf]  ;;  %v2967_v27 = vld [vmem:[#allocation5 + $0x1ac] sm:$0xf0]  ;;  %v2094_v29 = vor.u32 %v2935_v24, %v2093_v23  ;;  %1309 = vmatpush.bf16.msra.mxu2 %v2366_v21 }
  0x1f   :  { %v2349_v28 = vld [vmem:[#allocation5 + $0x2a0] sm:$0xf]  ;;  %v2999_v30 = vld [vmem:[#allocation5 + $0x2ac] sm:$0xf0]  ;;  %v2222_v33 = vor.u32 %v2967_v27, %v2221_v26  ;;  %1323 = vmatpush.bf16.msra.mxu3 %v2494_v25 }
  0x20   :  { %v2477_v31 = vld [vmem:[#allocation5 + $0x3a0] sm:$0xf]  ;;  %v3031_v32 = vld [vmem:[#allocation5 + $0x3ac] sm:$0xf0]  ;;  %v2350_v34 = vor.u32 %v2999_v30, %v2349_v28  ;;  %1282 = vmatpush.bf16.msra.mxu0 %v2094_v29 }
  0x21   :  { %v2077_v35 = vld [vmem:[#allocation5 + $0x80] sm:$0xf]  ;;  %v2931_v36 = vld [vmem:[#allocation5 + $0x8c] sm:$0xf0]  ;;  %v2478_v38 = vor.u32 %v3031_v32, %v2477_v31  ;;  %1296 = vmatpush.bf16.msra.mxu1 %v2222_v33  ;;  %v2941_v33 = vld [vmem:[#allocation5 + $0xe4] sm:$0xf] }
  0x22   :  { %v2205_v37 = vld [vmem:[#allocation5 + $0x180] sm:$0xf]  ;;  %v2963_v39 = vld [vmem:[#allocation5 + $0x18c] sm:$0xf0]  ;;  %v2078_v44 = vor.u32 %v2931_v36, %v2077_v35  ;;  %1310 = vmatpush.bf16.msra.mxu2 %v2350_v34  ;;  %v2127_v34 = vld [vmem:[#allocation5 + $0xf0] sm:$0xf0] }
  0x23   :  { %v2333_v40 = vld [vmem:[#allocation5 + $0x280] sm:$0xf]  ;;  %v2995_v41 = vld [vmem:[#allocation5 + $0x28c] sm:$0xf0]  ;;  %v2206_v45 = vor.u32 %v2963_v39, %v2205_v37  ;;  %1324 = vmatpush.bf16.msra.mxu3 %v2478_v38  ;;  %v2973_v37 = vld [vmem:[#allocation5 + $0x1e4] sm:$0xf] }
  0x24   :  { %v2461_v42 = vld [vmem:[#allocation5 + $0x380] sm:$0xf]  ;;  %v3027_v43 = vld [vmem:[#allocation5 + $0x38c] sm:$0xf0]  ;;  %v2334_v46 = vor.u32 %v2995_v41, %v2333_v40  ;;  %1283 = vmatpush.bf16.msra.mxu0 %v2078_v44  ;;  %v2255_v38 = vld [vmem:[#allocation5 + $0x1f0] sm:$0xf0] }
  0x25   :  { %v2061_v47 = vld [vmem:[#allocation5 + $0x60] sm:$0xf]  ;;  %v2927_v48 = vld [vmem:[#allocation5 + $0x6c] sm:$0xf0]  ;;  %v2462_v50 = vor.u32 %v3027_v43, %v2461_v42  ;;  %1297 = vmatpush.bf16.msra.mxu1 %v2206_v45  ;;  %v2130_v43 = vor.u32 %v2941_v33, %v2127_v34  ;;  %v2063_v33 = vld [vmem:[#allocation5 + $0x70] sm:$0xf0] }
  0x26   :  { %v2189_v49 = vld [vmem:[#allocation5 + $0x160] sm:$0xf]  ;;  %v2959_v51 = vld [vmem:[#allocation5 + $0x16c] sm:$0xf0]  ;;  %v2062_v56 = vor.u32 %v2927_v48, %v2061_v47  ;;  %1311 = vmatpush.bf16.msra.mxu2 %v2334_v46  ;;  %v2258_v47 = vor.u32 %v2973_v37, %v2255_v38  ;;  %v2937_v48 = vld [vmem:[#allocation5 + $0xc4] sm:$0xf] }
  0x27   :  { %v2317_v52 = vld [vmem:[#allocation5 + $0x260] sm:$0xf]  ;;  %v2991_v53 = vld [vmem:[#allocation5 + $0x26c] sm:$0xf0]  ;;  %v2190_v57 = vor.u32 %v2959_v51, %v2189_v49  ;;  %1325 = vmatpush.bf16.msra.mxu3 %v2462_v50  ;;  %v2111_v49 = vld [vmem:[#allocation5 + $0xd0] sm:$0xf0] }
  0x28   :  { %v2445_v54 = vld [vmem:[#allocation5 + $0x360] sm:$0xf]  ;;  %v3023_v55 = vld [vmem:[#allocation5 + $0x36c] sm:$0xf0]  ;;  %v2318_v58 = vor.u32 %v2991_v53, %v2317_v52  ;;  %1284 = vmatpush.bf16.msra.mxu0 %v2062_v56  ;;  %v2969_v50 = vld [vmem:[#allocation5 + $0x1c4] sm:$0xf] }
  0x29   :  { %v2045_v59 = vld [vmem:[#allocation5 + $0x40] sm:$0xf]  ;;  %v2923_v60 = vld [vmem:[#allocation5 + $0x4c] sm:$0xf0]  ;;  %v2446_v62 = vor.u32 %v3023_v55, %v2445_v54  ;;  %1298 = vmatpush.bf16.msra.mxu1 %v2190_v57  ;;  %v2239_v51 = vld [vmem:[#allocation5 + $0x1d0] sm:$0xf0] }
  0x2a   :  { %v2173_v61 = vld [vmem:[#allocation5 + $0x140] sm:$0xf]  ;;  %v2955_v63 = vld [vmem:[#allocation5 + $0x14c] sm:$0xf0]  ;;  %v2046_v4 = vor.u32 %v2923_v60, %v2045_v59  ;;  %1312 = vmatpush.bf16.msra.mxu2 %v2318_v58  ;;  %v2910_v53 = vld [vmem:[#allocation2 + $0x14] sm:$0xf0]  ;;  %v2114_v59 = vor.u32 %v2937_v48, %v2111_v49 }
  0x2b   :  { %v2301_v0 = vld [vmem:[#allocation5 + $0x240] sm:$0xf]  ;;  %v2987_v1 = vld [vmem:[#allocation5 + $0x24c] sm:$0xf0]  ;;  %v2174_v5 = vor.u32 %v2955_v63, %v2173_v61  ;;  %1326 = vmatpush.bf16.msra.mxu3 %v2446_v62  ;;  %v2933_v62 = vld [vmem:[#allocation5 + $0xa4] sm:$0xf]  ;;  %v2242_v63 = vor.u32 %v2969_v50, %v2239_v51 }
  0x2c   :  { %v2429_v2 = vld [vmem:[#allocation5 + $0x340] sm:$0xf]  ;;  %v3019_v3 = vld [vmem:[#allocation5 + $0x34c] sm:$0xf0]  ;;  %v2302_v6 = vor.u32 %v2987_v1, %v2301_v0  ;;  %1285 = vmatpush.bf16.msra.mxu0 %v2046_v4  ;;  %v2095_v0 = vld [vmem:[#allocation5 + $0xb0] sm:$0xf0] }
  0x2d   :  { %v2029_v7 = vld [vmem:[#allocation5 + $0x20] sm:$0xf]  ;;  %v2919_v8 = vld [vmem:[#allocation5 + $0x2c] sm:$0xf0]  ;;  %v2430_v10 = vor.u32 %v3019_v3, %v2429_v2  ;;  %1299 = vmatpush.bf16.msra.mxu1 %v2174_v5  ;;  %v2907_v1 = vld [vmem:[#allocation2 + $0x4] sm:$0xf] }
  0x2e   :  { %v2157_v9 = vld [vmem:[#allocation5 + $0x120] sm:$0xf]  ;;  %v2951_v11 = vld [vmem:[#allocation5 + $0x12c] sm:$0xf0]  ;;  %v2030_v16 = vor.u32 %v2919_v8, %v2029_v7  ;;  %1313 = vmatpush.bf16.msra.mxu2 %v2302_v6  ;;  %v1991_v2 = vld [vmem:[#allocation2 + $0x18] sm:$0xf0] }
  0x2f   :  { %v2285_v12 = vld [vmem:[#allocation5 + $0x220] sm:$0xf]  ;;  %v2983_v13 = vld [vmem:[#allocation5 + $0x22c] sm:$0xf0]  ;;  %v2158_v19 = vor.u32 %v2951_v11, %v2157_v9  ;;  %1327 = vmatpush.bf16.msra.mxu3 %v2430_v10  ;;  %v2965_v3 = vld [vmem:[#allocation5 + $0x1a4] sm:$0xf]  ;;  %v3345_v6 = vor.u32 %v2907_v1, %v1991_v2 }
  0x30   :  { %v2413_v14 = vld [vmem:[#allocation5 + $0x320] sm:$0xf]  ;;  %v3015_v15 = vld [vmem:[#allocation5 + $0x32c] sm:$0xf0]  ;;  %v2286_v20 = vor.u32 %v2983_v13, %v2285_v12  ;;  %1286 = vmatpush.bf16.msra.mxu0 %v2030_v16  ;;  %v2223_v4 = vld [vmem:[#allocation5 + $0x1b0] sm:$0xf0]  ;;  %v2098_v12 = vor.u32 %v2933_v62, %v2095_v0 }
  0x31   :  { %v2013_v17 = vld [vmem:[#allocation5] sm:$0xf]  ;;  %v2915_v18 = vld [vmem:[#allocation5 + $0xc] sm:$0xf0]  ;;  %v2414_v24 = vor.u32 %v3015_v15, %v2413_v14  ;;  %1300 = vmatpush.bf16.msra.mxu1 %v2158_v19  ;;  %v2929_v13 = vld [vmem:[#allocation5 + $0x84] sm:$0xf]  ;;  %v2226_v16 = vor.u32 %v2965_v3, %v2223_v4 }
  0x32   :  { %v2141_v21 = vld [vmem:[#allocation5 + $0x100] sm:$0xf]  ;;  %v2947_v22 = vld [vmem:[#allocation5 + $0x10c] sm:$0xf0]  ;;  %v2014_v31 = vor.u32 %v2915_v18, %v2013_v17  ;;  %1314 = vmatpush.bf16.msra.mxu2 %v2286_v20  ;;  %v2079_v14 = vld [vmem:[#allocation5 + $0x90] sm:$0xf0] }
  0x33   :  { %v2269_v23 = vld [vmem:[#allocation5 + $0x200] sm:$0xf]  ;;  %v2979_v25 = vld [vmem:[#allocation5 + $0x20c] sm:$0xf0]  ;;  %v2142_v35 = vor.u32 %v2947_v22, %v2141_v21  ;;  %1328 = vmatpush.bf16.msra.mxu3 %v2414_v24  ;;  %v1997_v15 = vld [vmem:[#allocation2 + $0x8] sm:$0xf] }
  0x34   :  { %v2397_v26 = vld [vmem:[#allocation5 + $0x300] sm:$0xf]  ;;  %v3011_v27 = vld [vmem:[#allocation5 + $0x30c] sm:$0xf0]  ;;  %v2270_v36 = vor.u32 %v2979_v25, %v2269_v23  ;;  %1287 = vmatpush.bf16.msra.mxu0 %v2014_v31  ;;  %v2908_v18 = vld [vmem:[#allocation2 + $0xc] sm:$0xf] }
  0x35   :  { %v2637_v28 = vld [vmem:[#allocation5 + $0x4e0] sm:$0xf]  ;;  %v3071_v29 = vld [vmem:[#allocation5 + $0x4ec] sm:$0xf0]  ;;  %v2398_v39 = vor.u32 %v3011_v27, %v2397_v26  ;;  %1301 = vmatpush.bf16.msra.mxu1 %v2142_v35  ;;  %v1999_v19 = vld [vmem:[#allocation2 + $0x20] sm:$0xf0]  ;;  %v2082_v26 = vor.u32 %v2929_v13, %v2079_v14 }
  0x36   :  { %v2765_v30 = vld [vmem:[#allocation5 + $0x5e0] sm:$0xf]  ;;  %v3103_v32 = vld [vmem:[#allocation5 + $0x5ec] sm:$0xf0]  ;;  %v2638_v40 = vor.u32 %v3071_v29, %v2637_v28  ;;  %1315 = vmatpush.bf16.msra.mxu2 %v2270_v36  ;;  %v2961_v20 = vld [vmem:[#allocation5 + $0x184] sm:$0xf]  ;;  %v3350_v23 = vor.u32 %v2908_v18, %v1999_v19 }
  0x37   :  { %v2621_v41 = vld [vmem:[#allocation5 + $0x4c0] sm:$0xf]  ;;  %v2766_v42 = vor.u32 %v3103_v32, %v2765_v30  ;;  %v3067_v44 = vld [vmem:[#allocation5 + $0x4cc] sm:$0xf0]  ;;  %1329 = vmatpush.bf16.msra.mxu3 %v2398_v39  ;;  %v2207_v21 = vld [vmem:[#allocation5 + $0x190] sm:$0xf0] }
  0x38   :  { %v2749_v45 = vld [vmem:[#allocation5 + $0x5c0] sm:$0xf]  ;;  %v3099_v46 = vld [vmem:[#allocation5 + $0x5cc] sm:$0xf0]  ;;  %1336 = vmatpush.bf16.msrb.mxu0 %v2638_v40  ;;  %v2622_v54 = vor.u32 %v3067_v44, %v2621_v41  ;;  %1302 = vmatmul.bf16.vlgmr.msra.gmra.mxu1 %v3345_v6  ;;  %v2210_v30 = vor.u32 %v2961_v20, %v2207_v21  ;;  %v2925_v32 = vld [vmem:[#allocation5 + $0x64] sm:$0xf] }
  0x39   :  { %v1989_v52 = vld [vmem:[#allocation2] sm:$0xf]  ;;  %v2605_v55 = vld [vmem:[#allocation5 + $0x4a0] sm:$0xf]  ;;  %1350 = vmatpush.bf16.msrb.mxu1 %v2766_v42  ;;  %v2750_v58 = vor.u32 %v3099_v46, %v2749_v45  ;;  %v2957_v34 = vld [vmem:[#allocation5 + $0x164] sm:$0xf]  ;;  %v2066_v38 = vor.u32 %v2925_v32, %v2063_v33 }
  0x3a   :  { %v3063_v56 = vld [vmem:[#allocation5 + $0x4ac] sm:$0xf0]  ;;  %v3342_v57 = vor.u32 %v2910_v53, %v1989_v52  ;;  %1364 = vmatpush.bf16.msrb.mxu2 %v2130_v43  ;;  %v2733_v60 = vld [vmem:[#allocation5 + $0x5a0] sm:$0xf]  ;;  %v2191_v35 = vld [vmem:[#allocation5 + $0x170] sm:$0xf0]  ;;  %1330 = vmatmul.bf16.vlgmr.msra.gmra.mxu3 %v3350_v23 }
  0x3b   :  { %v3095_v61 = vld [vmem:[#allocation5 + $0x5ac] sm:$0xf0]  ;;  %1378 = vmatpush.bf16.msrb.mxu3 %v2258_v47  ;;  %v2589_v5 = vld [vmem:[#allocation5 + $0x480] sm:$0xf]  ;;  %v2606_v7 = vor.u32 %v3063_v56, %v2605_v55  ;;  %v2194_v42 = vor.u32 %v2957_v34, %v2191_v35  ;;  %v2921_v44 = vld [vmem:[#allocation5 + $0x44] sm:$0xf] }
  0x3c   :  { %1288 = vmatmul.bf16.vlgmr.msra.gmra.mxu0 %v3342_v57  ;;  %v3059_v8 = vld [vmem:[#allocation5 + $0x48c] sm:$0xf0]  ;;  %v2717_v9 = vld [vmem:[#allocation5 + $0x580] sm:$0xf]  ;;  %v2734_v11 = vor.u32 %v3095_v61, %v2733_v60  ;;  %v2047_v45 = vld [vmem:[#allocation5 + $0x50] sm:$0xf0] }
  0x3d   :  { %1337 = vmatpush.bf16.msrb.mxu0 %v2622_v54  ;;  %v3091_v10 = vld [vmem:[#allocation5 + $0x58c] sm:$0xf0]  ;;  %1351 = vmatpush.bf16.msrb.mxu1 %v2750_v58  ;;  %v2590_v24 = vor.u32 %v3059_v8, %v2589_v5  ;;  %v2573_v27 = vld [vmem:[#allocation5 + $0x460] sm:$0xf]  ;;  %v2953_v46 = vld [vmem:[#allocation5 + $0x144] sm:$0xf]  ;;  %v2050_v50 = vor.u32 %v2921_v44, %v2047_v45 }
  0x3e   :  { %1365 = vmatpush.bf16.msrb.mxu2 %v2114_v59  ;;  %v2911_v17 = vld [vmem:[#allocation2 + $0x1c] sm:$0xf0]  ;;  %v2718_v25 = vor.u32 %v3091_v10, %v2717_v9  ;;  %v2701_v29 = vld [vmem:[#allocation5 + $0x560] sm:$0xf]  ;;  %v2175_v47 = vld [vmem:[#allocation5 + $0x150] sm:$0xf0] }
  0x3f   :  { %1379 = vmatpush.bf16.msrb.mxu3 %v2242_v63  ;;  %v3348_v22 = vor.u32 %v2911_v17, %v1997_v15  ;;  %v3055_v28 = vld [vmem:[#allocation5 + $0x46c] sm:$0xf0]  ;;  %v2557_v39 = vld [vmem:[#allocation5 + $0x440] sm:$0xf]  ;;  %v2178_v54 = vor.u32 %v2953_v46, %v2175_v47  ;;  %v2917_v56 = vld [vmem:[#allocation5 + $0x24] sm:$0xf] }
  0x40   :  { %v3087_v31 = vld [vmem:[#allocation5 + $0x56c] sm:$0xf0]  ;;  %v2574_v36 = vor.u32 %v3055_v28, %v2573_v27  ;;  %v2685_v41 = vld [vmem:[#allocation5 + $0x540] sm:$0xf]  ;;  %v2031_v58 = vld [vmem:[#allocation5 + $0x30] sm:$0xf0] }
  0x41   :  { %1338 = vmatpush.bf16.msrb.mxu0 %v2606_v7  ;;  %1352 = vmatpush.bf16.msrb.mxu1 %v2734_v11  ;;  %v2702_v37 = vor.u32 %v3087_v31, %v2701_v29  ;;  %v3051_v40 = vld [vmem:[#allocation5 + $0x44c] sm:$0xf0]  ;;  %v2541_v51 = vld [vmem:[#allocation5 + $0x420] sm:$0xf]  ;;  %v2949_v59 = vld [vmem:[#allocation5 + $0x124] sm:$0xf]  ;;  %v2034_v2 = vor.u32 %v2917_v56, %v2031_v58 }
  0x42   :  { %1366 = vmatpush.bf16.msrb.mxu2 %v2098_v12  ;;  %v3083_v43 = vld [vmem:[#allocation5 + $0x54c] sm:$0xf0]  ;;  %v2558_v48 = vor.u32 %v3051_v40, %v2557_v39  ;;  %v2669_v53 = vld [vmem:[#allocation5 + $0x520] sm:$0xf]  ;;  %v2159_v60 = vld [vmem:[#allocation5 + $0x130] sm:$0xf0] }
  0x43   :  { %1380 = vmatpush.bf16.msrb.mxu3 %v2226_v16  ;;  %1316 = vmatmul.bf16.vlgmr.msra.gmra.mxu2 %v3348_v22  ;;  %v2686_v49 = vor.u32 %v3083_v43, %v2685_v41  ;;  %v3047_v52 = vld [vmem:[#allocation5 + $0x42c] sm:$0xf0]  ;;  %v2525_v62 = vld [vmem:[#allocation5 + $0x400] sm:$0xf]  ;;  %v2913_v4 = vld [vmem:[#allocation5 + $0x4] sm:$0xf]  ;;  %v2162_v7 = vor.u32 %v2949_v59, %v2159_v60 }
  0x44   :  { %v3079_v55 = vld [vmem:[#allocation5 + $0x52c] sm:$0xf0]  ;;  %v2542_v61 = vor.u32 %v3047_v52, %v2541_v51  ;;  %v2653_v0 = vld [vmem:[#allocation5 + $0x500] sm:$0xf]  ;;  %v2015_v5 = vld [vmem:[#allocation5 + $0x10] sm:$0xf0] }
  0x45   :  { %1339 = vmatpush.bf16.msrb.mxu0 %v2590_v24  ;;  %1353 = vmatpush.bf16.msrb.mxu1 %v2718_v25  ;;  %v3043_v63 = vld [vmem:[#allocation5 + $0x40c] sm:$0xf0]  ;;  %v2670_v1 = vor.u32 %v3079_v55, %v2669_v53  ;;  %v2945_v8 = vld [vmem:[#allocation5 + $0x104] sm:$0xf]  ;;  %v2143_v9 = vld [vmem:[#allocation5 + $0x110] sm:$0xf0]  ;;  %v2018_v19 = vor.u32 %v2913_v4, %v2015_v5 }
  0x46   :  { %1367 = vmatpush.bf16.msrb.mxu2 %v2082_v26  ;;  %v3075_v3 = vld [vmem:[#allocation5 + $0x50c] sm:$0xf0]  ;;  %v3005_v10 = vld [vmem:[#allocation5 + $0x2e4] sm:$0xf]  ;;  %v2383_v11 = vld [vmem:[#allocation5 + $0x2f0] sm:$0xf0]  ;;  %v2526_v14 = vor.u32 %v3043_v63, %v2525_v62  ;;  %v2146_v25 = vor.u32 %v2945_v8, %v2143_v9 }
  0x47   :  { %1381 = vmatpush.bf16.msrb.mxu3 %v2210_v30  ;;  %v3037_v12 = vld [vmem:[#allocation5 + $0x3e4] sm:$0xf]  ;;  %v2511_v13 = vld [vmem:[#allocation5 + $0x3f0] sm:$0xf0]  ;;  %v2654_v18 = vor.u32 %v3075_v3, %v2653_v0  ;;  %v2005_v21 = vld [vmem:[#allocation2 + $0x10] sm:$0xf]  ;;  %v2386_v26 = vor.u32 %v3005_v10, %v2383_v11 }
  0x48   :  { %v3069_v15 = vld [vmem:[#allocation5 + $0x4e4] sm:$0xf]  ;;  %v2639_v16 = vld [vmem:[#allocation5 + $0x4f0] sm:$0xf0]  ;;  %v2912_v24 = vld [vmem:[#allocation2 + $0x24] sm:$0xf0]  ;;  %v2514_v29 = vor.u32 %v3037_v12, %v2511_v13 }
  0x49   :  { %1340 = vmatpush.bf16.msrb.mxu0 %v2574_v36  ;;  %1354 = vmatpush.bf16.msrb.mxu1 %v2702_v37  ;;  %v3101_v17 = vld [vmem:[#allocation5 + $0x5e4] sm:$0xf]  ;;  %v2767_v20 = vld [vmem:[#allocation5 + $0x5f0] sm:$0xf0]  ;;  %v2007_v28 = vld [vmem:[#allocation2 + $0x28] sm:$0xf0]  ;;  %v2642_v30 = vor.u32 %v3069_v15, %v2639_v16  ;;  %v3354_v35 = vor.u32 %v2912_v24, %v2005_v21 }
  0x4a   :  { %1368 = vmatpush.bf16.msrb.mxu2 %v2066_v38  ;;  %v2909_v27 = vld [vmem:[#allocation2 + $0x14] sm:$0xf]  ;;  %v2367_v32 = vld [vmem:[#allocation5 + $0x2d0] sm:$0xf0]  ;;  %v2770_v34 = vor.u32 %v3101_v17, %v2767_v20 }
  0x4b   :  { %1382 = vmatpush.bf16.msrb.mxu3 %v2194_v42  ;;  %v3001_v31 = vld [vmem:[#allocation5 + $0x2c4] sm:$0xf]  ;;  %v2495_v36 = vld [vmem:[#allocation5 + $0x3d0] sm:$0xf0]  ;;  %v3356_v39 = vor.u32 %v2909_v27, %v2007_v28 }
  0x4c   :  { %v3033_v33 = vld [vmem:[#allocation5 + $0x3c4] sm:$0xf]  ;;  %v2623_v38 = vld [vmem:[#allocation5 + $0x4d0] sm:$0xf0]  ;;  %v2370_v42 = vor.u32 %v3001_v31, %v2367_v32 }
  0x4d   :  { %1341 = vmatpush.bf16.msrb.mxu0 %v2558_v48  ;;  %1355 = vmatpush.bf16.msrb.mxu1 %v2686_v49  ;;  %v3065_v37 = vld [vmem:[#allocation5 + $0x4c4] sm:$0xf]  ;;  %v2751_v41 = vld [vmem:[#allocation5 + $0x5d0] sm:$0xf0]  ;;  %v2498_v43 = vor.u32 %v3033_v33, %v2495_v36 }
  0x4e   :  { %1369 = vmatpush.bf16.msrb.mxu2 %v2050_v50  ;;  %v3097_v40 = vld [vmem:[#allocation5 + $0x5c4] sm:$0xf]  ;;  %v2626_v44 = vor.u32 %v3065_v37, %v2623_v38  ;;  %v2351_v46 = vld [vmem:[#allocation5 + $0x2b0] sm:$0xf0] }
  0x4f   :  { %1383 = vmatpush.bf16.msrb.mxu3 %v2178_v54  ;;  %v2997_v45 = vld [vmem:[#allocation5 + $0x2a4] sm:$0xf]  ;;  %v2754_v48 = vor.u32 %v3097_v40, %v2751_v41  ;;  %v2479_v49 = vld [vmem:[#allocation5 + $0x3b0] sm:$0xf0] }
  0x50   :  { %v3029_v47 = vld [vmem:[#allocation5 + $0x3a4] sm:$0xf]  ;;  %v2607_v51 = vld [vmem:[#allocation5 + $0x4b0] sm:$0xf0]  ;;  %v2354_v54 = vor.u32 %v2997_v45, %v2351_v46 }
  0x51   :  { %1342 = vmatpush.bf16.msrb.mxu0 %v2542_v61  ;;  %1356 = vmatpush.bf16.msrb.mxu1 %v2670_v1  ;;  %v3061_v50 = vld [vmem:[#allocation5 + $0x4a4] sm:$0xf]  ;;  %v2735_v53 = vld [vmem:[#allocation5 + $0x5b0] sm:$0xf0]  ;;  %v2482_v55 = vor.u32 %v3029_v47, %v2479_v49 }
  0x52   :  { %1370 = vmatpush.bf16.msrb.mxu2 %v2034_v2  ;;  %v3093_v52 = vld [vmem:[#allocation5 + $0x5a4] sm:$0xf]  ;;  %v2610_v56 = vor.u32 %v3061_v50, %v2607_v51  ;;  %v2335_v59 = vld [vmem:[#allocation5 + $0x290] sm:$0xf0] }
  0x53   :  { %1384 = vmatpush.bf16.msrb.mxu3 %v2162_v7  ;;  %v2993_v58 = vld [vmem:[#allocation5 + $0x284] sm:$0xf]  ;;  %v2738_v61 = vor.u32 %v3093_v52, %v2735_v53  ;;  %v2463_v62 = vld [vmem:[#allocation5 + $0x390] sm:$0xf0] }
  0x54   :  { %v3025_v60 = vld [vmem:[#allocation5 + $0x384] sm:$0xf]  ;;  %v2591_v0 = vld [vmem:[#allocation5 + $0x490] sm:$0xf0]  ;;  %v2338_v3 = vor.u32 %v2993_v58, %v2335_v59  ;;  %v2944_v58 = vld [vmem:[#allocation5 + $0xf4] sm:$0xf0] }
  0x55   :  { %1343 = vmatpush.bf16.msrb.mxu0 %v2526_v14  ;;  %1357 = vmatpush.bf16.msrb.mxu1 %v2654_v18  ;;  %v3057_v63 = vld [vmem:[#allocation5 + $0x484] sm:$0xf]  ;;  %v2719_v2 = vld [vmem:[#allocation5 + $0x590] sm:$0xf0]  ;;  %v2466_v4 = vor.u32 %v3025_v60, %v2463_v62  ;;  %v2261_v59 = vld [vmem:[#allocation5 + $0x1e8] sm:$0xf] }
  0x56   :  { %1371 = vmatpush.bf16.msrb.mxu2 %v2018_v19  ;;  %v3089_v1 = vld [vmem:[#allocation5 + $0x584] sm:$0xf]  ;;  %v2594_v5 = vor.u32 %v3057_v63, %v2591_v0  ;;  %v2319_v8 = vld [vmem:[#allocation5 + $0x270] sm:$0xf0]  ;;  %v2389_v62 = vld [vmem:[#allocation5 + $0x2e8] sm:$0xf] }
  0x57   :  { %1385 = vmatpush.bf16.msrb.mxu3 %v2146_v25  ;;  %v2989_v7 = vld [vmem:[#allocation5 + $0x264] sm:$0xf]  ;;  %v2722_v10 = vor.u32 %v3089_v1, %v2719_v2  ;;  %v2447_v11 = vld [vmem:[#allocation5 + $0x370] sm:$0xf0]  ;;  %v3008_v63 = vld [vmem:[#allocation5 + $0x2f4] sm:$0xf0] }
  0x58   :  { %1344 = vmatmul.bf16.vlgmr.msrb.gmra.mxu0 %v3354_v35  ;;  %1358 = vmatmul.bf16.vlgmr.msrb.gmra.mxu1 %v3356_v39  ;;  %v3021_v9 = vld [vmem:[#allocation5 + $0x364] sm:$0xf]  ;;  %v2575_v13 = vld [vmem:[#allocation5 + $0x470] sm:$0xf0]  ;;  %v2322_v16 = vor.u32 %v2989_v7, %v2319_v8  ;;  %v2517_v2 = vld [vmem:[#allocation5 + $0x3e8] sm:$0xf]  ;;  %v2390_v8 = vor.u32 %v3008_v63, %v2389_v62 }
  0x59   :  { %1392 = vmatpush.bf16.msra.mxu0 %v2386_v26  ;;  %1406 = vmatpush.bf16.msra.mxu1 %v2514_v29  ;;  %v3053_v12 = vld [vmem:[#allocation5 + $0x464] sm:$0xf]  ;;  %v2703_v15 = vld [vmem:[#allocation5 + $0x570] sm:$0xf0]  ;;  %v2450_v17 = vor.u32 %v3021_v9, %v2447_v11  ;;  %v2117_v9 = vld [vmem:[#allocation5 + $0xc8] sm:$0xf] }
  0x5a   :  { %1420 = vmatpush.bf16.msra.mxu2 %v2642_v30  ;;  %1386 = vmatmul.bf16.vlgmr.msrb.gmra.mxu3 %v3345_v6  ;;  %v3085_v14 = vld [vmem:[#allocation5 + $0x564] sm:$0xf]  ;;  %v2578_v18 = vor.u32 %v3053_v12, %v2575_v13  ;;  %v2303_v20 = vld [vmem:[#allocation5 + $0x250] sm:$0xf0]  ;;  %v2245_v11 = vld [vmem:[#allocation5 + $0x1c8] sm:$0xf] }
  0x5b   :  { %1434 = vmatpush.bf16.msra.mxu3 %v2770_v34  ;;  %1372 = vmatmul.bf16.vlgmr.msrb.gmra.mxu2 %v3342_v57  ;;  %v2985_v19 = vld [vmem:[#allocation5 + $0x244] sm:$0xf]  ;;  %v2706_v24 = vor.u32 %v3085_v14, %v2703_v15  ;;  %v2431_v25 = vld [vmem:[#allocation5 + $0x350] sm:$0xf0]  ;;  %v2972_v13 = vld [vmem:[#allocation5 + $0x1d4] sm:$0xf0] }
  0x5c   :  { %v3017_v21 = vld [vmem:[#allocation5 + $0x344] sm:$0xf]  ;;  %v2559_v27 = vld [vmem:[#allocation5 + $0x450] sm:$0xf0]  ;;  %v2306_v30 = vor.u32 %v2985_v19, %v2303_v20  ;;  %v2373_v14 = vld [vmem:[#allocation5 + $0x2c8] sm:$0xf]  ;;  %v2246_v19 = vor.u32 %v2972_v13, %v2245_v11 }
  0x5d   :  { %1393 = vmatpush.bf16.msra.mxu0 %v2370_v42  ;;  %1407 = vmatpush.bf16.msra.mxu1 %v2498_v43  ;;  %v3049_v26 = vld [vmem:[#allocation5 + $0x444] sm:$0xf]  ;;  %v2687_v29 = vld [vmem:[#allocation5 + $0x550] sm:$0xf0]  ;;  %v2434_v31 = vor.u32 %v3017_v21, %v2431_v25  ;;  %v3004_v15 = vld [vmem:[#allocation5 + $0x2d4] sm:$0xf0] }
  0x5e   :  { %1421 = vmatpush.bf16.msra.mxu2 %v2626_v44  ;;  %v3081_v28 = vld [vmem:[#allocation5 + $0x544] sm:$0xf]  ;;  %v2562_v32 = vor.u32 %v3049_v26, %v2559_v27  ;;  %v2287_v34 = vld [vmem:[#allocation5 + $0x230] sm:$0xf0]  ;;  %v2374_v20 = vor.u32 %v3004_v15, %v2373_v14  ;;  %v2101_v21 = vld [vmem:[#allocation5 + $0xa8] sm:$0xf] }
  0x5f   :  { %1435 = vmatpush.bf16.msra.mxu3 %v2754_v48  ;;  %v2981_v33 = vld [vmem:[#allocation5 + $0x224] sm:$0xf]  ;;  %v2690_v37 = vor.u32 %v3081_v28, %v2687_v29  ;;  %v2415_v38 = vld [vmem:[#allocation5 + $0x330] sm:$0xf0]  ;;  %v2229_v25 = vld [vmem:[#allocation5 + $0x1a8] sm:$0xf] }
  0x60   :  { %v3013_v36 = vld [vmem:[#allocation5 + $0x324] sm:$0xf]  ;;  %v2543_v41 = vld [vmem:[#allocation5 + $0x430] sm:$0xf0]  ;;  %v2290_v44 = vor.u32 %v2981_v33, %v2287_v34  ;;  %v2968_v27 = vld [vmem:[#allocation5 + $0x1b4] sm:$0xf0] }
  0x61   :  { %1394 = vmatpush.bf16.msra.mxu0 %v2354_v54  ;;  %1408 = vmatpush.bf16.msra.mxu1 %v2482_v55  ;;  %v3045_v40 = vld [vmem:[#allocation5 + $0x424] sm:$0xf]  ;;  %v2671_v43 = vld [vmem:[#allocation5 + $0x530] sm:$0xf0]  ;;  %v2418_v48 = vor.u32 %v3013_v36, %v2415_v38  ;;  %v2357_v28 = vld [vmem:[#allocation5 + $0x2a8] sm:$0xf]  ;;  %v2230_v33 = vor.u32 %v2968_v27, %v2229_v25 }
  0x62   :  { %1422 = vmatpush.bf16.msra.mxu2 %v2610_v56  ;;  %v3077_v42 = vld [vmem:[#allocation5 + $0x524] sm:$0xf]  ;;  %v2271_v46 = vld [vmem:[#allocation5 + $0x210] sm:$0xf0]  ;;  %v2546_v49 = vor.u32 %v3045_v40, %v2543_v41  ;;  %v2133_v56 = vld [vmem:[#allocation5 + $0xe8] sm:$0xf] }
  0x63   :  { %1436 = vmatpush.bf16.msra.mxu3 %v2738_v61  ;;  %v2977_v45 = vld [vmem:[#allocation5 + $0x204] sm:$0xf]  ;;  %v2399_v50 = vld [vmem:[#allocation5 + $0x310] sm:$0xf0]  ;;  %v2674_v53 = vor.u32 %v3077_v42, %v2671_v43  ;;  %v2976_v61 = vld [vmem:[#allocation5 + $0x1f4] sm:$0xf0] }
  0x64   :  { %v3009_v47 = vld [vmem:[#allocation5 + $0x304] sm:$0xf]  ;;  %v2527_v52 = vld [vmem:[#allocation5 + $0x410] sm:$0xf0]  ;;  %v2274_v60 = vor.u32 %v2977_v45, %v2271_v46  ;;  %v2262_v7 = vor.u32 %v2976_v61, %v2261_v59  ;;  %v3000_v29 = vld [vmem:[#allocation5 + $0x2b4] sm:$0xf0] }
  0x65   :  { %1395 = vmatpush.bf16.msra.mxu0 %v2338_v3  ;;  %1409 = vmatpush.bf16.msra.mxu1 %v2466_v4  ;;  %v3041_v51 = vld [vmem:[#allocation5 + $0x404] sm:$0xf]  ;;  %v2655_v55 = vld [vmem:[#allocation5 + $0x510] sm:$0xf0]  ;;  %v2402_v0 = vor.u32 %v3009_v47, %v2399_v50  ;;  %v3040_v3 = vld [vmem:[#allocation5 + $0x3f4] sm:$0xf0]  ;;  %v2358_v34 = vor.u32 %v3000_v29, %v2357_v28 }
  0x66   :  { %1423 = vmatpush.bf16.msra.mxu2 %v2594_v5  ;;  %v3073_v54 = vld [vmem:[#allocation5 + $0x504] sm:$0xf]  ;;  %v2530_v1 = vor.u32 %v3041_v51, %v2527_v52  ;;  %v2134_v5 = vor.u32 %v2944_v58, %v2133_v56  ;;  %v2518_v12 = vor.u32 %v3040_v3, %v2517_v2  ;;  %v2085_v36 = vld [vmem:[#allocation5 + $0x88] sm:$0xf]  ;;  %v2964_v41 = vld [vmem:[#allocation5 + $0x194] sm:$0xf0] }
  0x67   :  { %1437 = vmatpush.bf16.msra.mxu3 %v2722_v10  ;;  %v2658_v4 = vor.u32 %v3073_v54, %v2655_v55  ;;  %v2940_v10 = vld [vmem:[#allocation5 + $0xd4] sm:$0xf0]  ;;  %v2213_v38 = vld [vmem:[#allocation5 + $0x188] sm:$0xf] }
  0x68   :  { %v2341_v42 = vld [vmem:[#allocation5 + $0x288] sm:$0xf]  ;;  %v2996_v43 = vld [vmem:[#allocation5 + $0x294] sm:$0xf0]  ;;  %v2214_v47 = vor.u32 %v2964_v41, %v2213_v38  ;;  %v2942_v41 = vld [vmem:[#allocation5 + $0xec] sm:$0xf] }
  0x69   :  { %1396 = vmatpush.bf16.msra.mxu0 %v2322_v16  ;;  %1410 = vmatpush.bf16.msra.mxu1 %v2450_v17  ;;  %v2501_v16 = vld [vmem:[#allocation5 + $0x3c8] sm:$0xf]  ;;  %v3036_v17 = vld [vmem:[#allocation5 + $0x3d4] sm:$0xf0] }
  0x6a   :  { %1424 = vmatpush.bf16.msra.mxu2 %v2578_v18  ;;  %v2118_v18 = vor.u32 %v2940_v10, %v2117_v9  ;;  %v2502_v26 = vor.u32 %v3036_v17, %v2501_v16  ;;  %v3028_v45 = vld [vmem:[#allocation5 + $0x394] sm:$0xf0]  ;;  %v2197_v51 = vld [vmem:[#allocation5 + $0x168] sm:$0xf] }
  0x6b   :  { %1438 = vmatpush.bf16.msra.mxu3 %v2706_v24  ;;  %v2936_v24 = vld [vmem:[#allocation5 + $0xb4] sm:$0xf0]  ;;  %v2325_v54 = vld [vmem:[#allocation5 + $0x268] sm:$0xf] }
  0x6c   :  { %v2928_v50 = vld [vmem:[#allocation5 + $0x74] sm:$0xf0]  ;;  %v2453_v56 = vld [vmem:[#allocation5 + $0x368] sm:$0xf] }
  0x6d   :  { %1397 = vmatpush.bf16.msra.mxu0 %v2306_v30  ;;  %1411 = vmatpush.bf16.msra.mxu1 %v2434_v31  ;;  %v2485_v30 = vld [vmem:[#allocation5 + $0x3a8] sm:$0xf]  ;;  %v3032_v31 = vld [vmem:[#allocation5 + $0x3b4] sm:$0xf0] }
  0x6e   :  { %1425 = vmatpush.bf16.msra.mxu2 %v2562_v32  ;;  %v2102_v32 = vor.u32 %v2936_v24, %v2101_v21  ;;  %v2486_v40 = vor.u32 %v3032_v31, %v2485_v30  ;;  %v2992_v55 = vld [vmem:[#allocation5 + $0x274] sm:$0xf0]  ;;  %v2053_v62 = vld [vmem:[#allocation5 + $0x48] sm:$0xf] }
  0x6f   :  { %1439 = vmatpush.bf16.msra.mxu3 %v2690_v37  ;;  %v2932_v37 = vld [vmem:[#allocation5 + $0x94] sm:$0xf0]  ;;  %v2326_v61 = vor.u32 %v2992_v55, %v2325_v54  ;;  %v2309_v3 = vld [vmem:[#allocation5 + $0x248] sm:$0xf] }
  0x70   :  { %v2086_v46 = vor.u32 %v2932_v37, %v2085_v36  ;;  %v3024_v58 = vld [vmem:[#allocation5 + $0x374] sm:$0xf0]  ;;  %v2037_v11 = vld [vmem:[#allocation5 + $0x28] sm:$0xf] }
  0x71   :  { %1398 = vmatpush.bf16.msra.mxu0 %v2290_v44  ;;  %1412 = vmatpush.bf16.msra.mxu1 %v2418_v48  ;;  %v2469_v44 = vld [vmem:[#allocation5 + $0x388] sm:$0xf]  ;;  %v2342_v48 = vor.u32 %v2996_v43, %v2341_v42  ;;  %v2924_v63 = vld [vmem:[#allocation5 + $0x54] sm:$0xf0]  ;;  %v2135_v42 = vld [vmem:[#allocation5 + $0xf8] sm:$0xf0] }
  0x72   :  { %1426 = vmatpush.bf16.msra.mxu2 %v2546_v49  ;;  %v2069_v49 = vld [vmem:[#allocation5 + $0x68] sm:$0xf]  ;;  %v2470_v52 = vor.u32 %v3028_v45, %v2469_v44  ;;  %v2956_v2 = vld [vmem:[#allocation5 + $0x154] sm:$0xf0]  ;;  %v2974_v45 = vld [vmem:[#allocation5 + $0x1ec] sm:$0xf] }
  0x73   :  { %1440 = vmatpush.bf16.msra.mxu3 %v2674_v53  ;;  %v2960_v53 = vld [vmem:[#allocation5 + $0x174] sm:$0xf0]  ;;  %v2070_v59 = vor.u32 %v2928_v50, %v2069_v49  ;;  %v2165_v13 = vld [vmem:[#allocation5 + $0x128] sm:$0xf]  ;;  %v2138_v50 = vor.u32 %v2942_v41, %v2135_v42 }
  0x74   :  { %v2952_v15 = vld [vmem:[#allocation5 + $0x134] sm:$0xf0]  ;;  %v2293_v16 = vld [vmem:[#allocation5 + $0x228] sm:$0xf] }
  0x75   :  { %1399 = vmatpush.bf16.msra.mxu0 %v2274_v60  ;;  %1413 = vmatpush.bf16.msra.mxu1 %v2402_v0  ;;  %v2198_v60 = vor.u32 %v2960_v53, %v2197_v51  ;;  %v2181_v0 = vld [vmem:[#allocation5 + $0x148] sm:$0xf]  ;;  %v2984_v17 = vld [vmem:[#allocation5 + $0x234] sm:$0xf0]  ;;  %v2166_v25 = vor.u32 %v2952_v15, %v2165_v13 }
  0x76   :  { %1427 = vmatpush.bf16.msra.mxu2 %v2530_v1  ;;  %v2454_v1 = vor.u32 %v3024_v58, %v2453_v56  ;;  %v2182_v9 = vor.u32 %v2956_v2, %v2181_v0  ;;  %v2021_v21 = vld [vmem:[#allocation5 + $0x8] sm:$0xf]  ;;  %v2916_v24 = vld [vmem:[#allocation5 + $0x14] sm:$0xf0]  ;;  %v2938_v56 = vld [vmem:[#allocation5 + $0xcc] sm:$0xf] }
  0x77   :  { %1441 = vmatpush.bf16.msra.mxu3 %v2658_v4  ;;  %v2988_v4 = vld [vmem:[#allocation5 + $0x254] sm:$0xf0]  ;;  %v2149_v27 = vld [vmem:[#allocation5 + $0x108] sm:$0xf]  ;;  %v2022_v38 = vor.u32 %v2916_v24, %v2021_v21  ;;  %v2119_v58 = vld [vmem:[#allocation5 + $0xd8] sm:$0xf0] }
  0x78   :  { %1400 = vmatmul.bf16.vlgmr.msra.gmra.mxu0 %v3348_v22  ;;  %1414 = vmatmul.bf16.vlgmr.msra.gmra.mxu1 %v3350_v23  ;;  %v2310_v10 = vor.u32 %v2988_v4, %v2309_v3  ;;  %v2948_v28 = vld [vmem:[#allocation5 + $0x114] sm:$0xf0]  ;;  %v2277_v29 = vld [vmem:[#allocation5 + $0x208] sm:$0xf]  ;;  %v2215_v21 = vld [vmem:[#allocation5 + $0x198] sm:$0xf0] }
  0x79   :  { %1448 = vmatpush.bf16.msrb.mxu0 %v2134_v5  ;;  %1462 = vmatpush.bf16.msrb.mxu1 %v2262_v7  ;;  %v2437_v5 = vld [vmem:[#allocation5 + $0x348] sm:$0xf]  ;;  %v3020_v7 = vld [vmem:[#allocation5 + $0x354] sm:$0xf0]  ;;  %v2150_v43 = vor.u32 %v2948_v28, %v2149_v27 }
  0x7a   :  { %1476 = vmatpush.bf16.msrb.mxu2 %v2390_v8  ;;  %1442 = vmatmul.bf16.vlgmr.msra.gmra.mxu3 %v3356_v39  ;;  %v2054_v8 = vor.u32 %v2924_v63, %v2053_v62  ;;  %v2438_v14 = vor.u32 %v3020_v7, %v2437_v5  ;;  %v2980_v31 = vld [vmem:[#allocation5 + $0x214] sm:$0xf0]  ;;  %v2773_v37 = vld [vmem:[#allocation5 + $0x5e8] sm:$0xf]  ;;  %v2122_v63 = vor.u32 %v2938_v56, %v2119_v58  ;;  %v2934_v5 = vld [vmem:[#allocation5 + $0xac] sm:$0xf] }
  0x7b   :  { %1490 = vmatpush.bf16.msrb.mxu3 %v2518_v12  ;;  %1428 = vmatmul.bf16.vlgmr.msra.gmra.mxu2 %v3354_v35  ;;  %v2920_v12 = vld [vmem:[#allocation5 + $0x34] sm:$0xf0]  ;;  %v2278_v44 = vor.u32 %v2980_v31, %v2277_v29  ;;  %v2629_v51 = vld [vmem:[#allocation5 + $0x4c8] sm:$0xf]  ;;  %v2103_v7 = vld [vmem:[#allocation5 + $0xb8] sm:$0xf0] }
  0x7c   :  { %v3072_v36 = vld [vmem:[#allocation5 + $0x4f4] sm:$0xf0]  ;;  %v2757_v53 = vld [vmem:[#allocation5 + $0x5c8] sm:$0xf] }
  0x7d   :  { %1449 = vmatpush.bf16.msrb.mxu0 %v2118_v18  ;;  %1463 = vmatpush.bf16.msrb.mxu1 %v2246_v19  ;;  %v2421_v18 = vld [vmem:[#allocation5 + $0x328] sm:$0xf]  ;;  %v3016_v19 = vld [vmem:[#allocation5 + $0x334] sm:$0xf0] }
  0x7e   :  { %1477 = vmatpush.bf16.msrb.mxu2 %v2374_v20  ;;  %v2038_v20 = vor.u32 %v2920_v12, %v2037_v11  ;;  %v2422_v30 = vor.u32 %v3016_v19, %v2421_v18  ;;  %v3100_v55 = vld [vmem:[#allocation5 + $0x5d4] sm:$0xf0]  ;;  %v2613_v0 = vld [vmem:[#allocation5 + $0x4a8] sm:$0xf]  ;;  %v2106_v12 = vor.u32 %v2934_v5, %v2103_v7  ;;  %v2930_v18 = vld [vmem:[#allocation5 + $0x8c] sm:$0xf] }
  0x7f   :  { %1491 = vmatpush.bf16.msrb.mxu3 %v2502_v26  ;;  %v2294_v26 = vor.u32 %v2984_v17, %v2293_v16  ;;  %v2758_v62 = vor.u32 %v3100_v55, %v2757_v53  ;;  %v2741_v2 = vld [vmem:[#allocation5 + $0x5a8] sm:$0xf]  ;;  %v3096_v4 = vld [vmem:[#allocation5 + $0x5b4] sm:$0xf0]  ;;  %v2087_v19 = vld [vmem:[#allocation5 + $0x98] sm:$0xf0] }
  0x80   :  { %v2742_v11 = vor.u32 %v3096_v4, %v2741_v2  ;;  %v2597_v13 = vld [vmem:[#allocation5 + $0x488] sm:$0xf]  ;;  %v3092_v17 = vld [vmem:[#allocation5 + $0x594] sm:$0xf0]  ;;  %v2914_v7 = vld [vmem:[#allocation5 + $0xc] sm:$0xf] }
  0x81   :  { %1450 = vmatpush.bf16.msrb.mxu0 %v2102_v32  ;;  %1464 = vmatpush.bf16.msrb.mxu1 %v2230_v33  ;;  %v2405_v32 = vld [vmem:[#allocation5 + $0x308] sm:$0xf]  ;;  %v3012_v33 = vld [vmem:[#allocation5 + $0x314] sm:$0xf0] }
  0x82   :  { %1478 = vmatpush.bf16.msrb.mxu2 %v2358_v34  ;;  %v2645_v34 = vld [vmem:[#allocation5 + $0x4e8] sm:$0xf]  ;;  %v3056_v28 = vld [vmem:[#allocation5 + $0x474] sm:$0xf0] }
  0x83   :  { %1492 = vmatpush.bf16.msrb.mxu3 %v2486_v40  ;;  %v3104_v40 = vld [vmem:[#allocation5 + $0x5f4] sm:$0xf0]  ;;  %v2725_v15 = vld [vmem:[#allocation5 + $0x588] sm:$0xf] }
  0x84   :  { %v2774_v49 = vor.u32 %v3104_v40, %v2773_v37  ;;  %v2581_v27 = vld [vmem:[#allocation5 + $0x468] sm:$0xf]  ;;  %v3088_v31 = vld [vmem:[#allocation5 + $0x574] sm:$0xf0] }
  0x85   :  { %1451 = vmatpush.bf16.msrb.mxu0 %v2086_v46  ;;  %1465 = vmatpush.bf16.msrb.mxu1 %v2214_v47  ;;  %v2263_v46 = vld [vmem:[#allocation5 + $0x1f8] sm:$0xf0]  ;;  %v2406_v47 = vor.u32 %v3012_v33, %v2405_v32  ;;  %v2709_v29 = vld [vmem:[#allocation5 + $0x568] sm:$0xf]  ;;  %v2926_v32 = vld [vmem:[#allocation5 + $0x6c] sm:$0xf]  ;;  %v2582_v37 = vor.u32 %v3056_v28, %v2581_v27 }
  0x86   :  { %1479 = vmatpush.bf16.msrb.mxu2 %v2342_v48  ;;  %v2646_v48 = vor.u32 %v3072_v36, %v2645_v34  ;;  %v2266_v54 = vor.u32 %v2974_v45, %v2263_v46  ;;  %v2071_v33 = vld [vmem:[#allocation5 + $0x78] sm:$0xf0]  ;;  %v2958_v34 = vld [vmem:[#allocation5 + $0x16c] sm:$0xf]  ;;  %v2565_v41 = vld [vmem:[#allocation5 + $0x448] sm:$0xf] }
  0x87   :  { %1493 = vmatpush.bf16.msrb.mxu3 %v2470_v52  ;;  %v3068_v52 = vld [vmem:[#allocation5 + $0x4d4] sm:$0xf0]  ;;  %v2199_v36 = vld [vmem:[#allocation5 + $0x178] sm:$0xf0]  ;;  %v2074_v40 = vor.u32 %v2926_v32, %v2071_v33  ;;  %v2922_v46 = vld [vmem:[#allocation5 + $0x4c] sm:$0xf] }
  0x88   :  { %v3052_v42 = vld [vmem:[#allocation5 + $0x454] sm:$0xf0]  ;;  %v2549_v53 = vld [vmem:[#allocation5 + $0x428] sm:$0xf]  ;;  %v2503_v33 = vld [vmem:[#allocation5 + $0x3d8] sm:$0xf0] }
  0x89   :  { %1452 = vmatpush.bf16.msrb.mxu0 %v2070_v59  ;;  %1466 = vmatpush.bf16.msrb.mxu1 %v2198_v60  ;;  %v2970_v59 = vld [vmem:[#allocation5 + $0x1cc] sm:$0xf]  ;;  %v2247_v60 = vld [vmem:[#allocation5 + $0x1d8] sm:$0xf0]  ;;  %v3084_v45 = vld [vmem:[#allocation5 + $0x554] sm:$0xf0] }
  0x8a   :  { %1480 = vmatpush.bf16.msrb.mxu2 %v2326_v61  ;;  %v2630_v61 = vor.u32 %v3068_v52, %v2629_v51  ;;  %v2250_v3 = vor.u32 %v2970_v59, %v2247_v60  ;;  %v2677_v55 = vld [vmem:[#allocation5 + $0x528] sm:$0xf]  ;;  %v3080_v58 = vld [vmem:[#allocation5 + $0x534] sm:$0xf0]  ;;  %v2918_v59 = vld [vmem:[#allocation5 + $0x2c] sm:$0xf] }
  0x8b   :  { %1494 = vmatpush.bf16.msrb.mxu3 %v2454_v1  ;;  %v3064_v1 = vld [vmem:[#allocation5 + $0x4b4] sm:$0xf0]  ;;  %v2039_v60 = vld [vmem:[#allocation5 + $0x38] sm:$0xf0]  ;;  %v2678_v2 = vor.u32 %v3080_v58, %v2677_v55  ;;  %v2661_v4 = vld [vmem:[#allocation5 + $0x508] sm:$0xf] }
  0x8c   :  { %v3076_v5 = vld [vmem:[#allocation5 + $0x514] sm:$0xf0]  ;;  %v2994_v55 = vld [vmem:[#allocation5 + $0x28c] sm:$0xf] }
  0x8d   :  { %1453 = vmatpush.bf16.msrb.mxu0 %v2054_v8  ;;  %1467 = vmatpush.bf16.msrb.mxu1 %v2182_v9  ;;  %v2966_v8 = vld [vmem:[#allocation5 + $0x1ac] sm:$0xf]  ;;  %v2231_v9 = vld [vmem:[#allocation5 + $0x1b8] sm:$0xf0] }
  0x8e   :  { %1481 = vmatpush.bf16.msrb.mxu2 %v2310_v10  ;;  %v2614_v10 = vor.u32 %v3064_v1, %v2613_v0  ;;  %v2234_v16 = vor.u32 %v2966_v8, %v2231_v9  ;;  %v2533_v0 = vld [vmem:[#allocation5 + $0x408] sm:$0xf]  ;;  %v3044_v1 = vld [vmem:[#allocation5 + $0x414] sm:$0xf0]  ;;  %v2023_v9 = vld [vmem:[#allocation5 + $0x18] sm:$0xf0] }
  0x8f   :  { %1495 = vmatpush.bf16.msrb.mxu3 %v2438_v14  ;;  %v3060_v14 = vld [vmem:[#allocation5 + $0x494] sm:$0xf0]  ;;  %v3026_v58 = vld [vmem:[#allocation5 + $0x38c] sm:$0xf] }
  0x90   :  { %v2598_v24 = vor.u32 %v3060_v14, %v2597_v13  ;;  %v2391_v13 = vld [vmem:[#allocation5 + $0x2f8] sm:$0xf0]  ;;  %v3038_v14 = vld [vmem:[#allocation5 + $0x3ec] sm:$0xf] }
  0x91   :  { %1454 = vmatpush.bf16.msrb.mxu0 %v2038_v20  ;;  %1468 = vmatpush.bf16.msrb.mxu1 %v2166_v25  ;;  %v2962_v20 = vld [vmem:[#allocation5 + $0x18c] sm:$0xf]  ;;  %v2726_v25 = vor.u32 %v3092_v17, %v2725_v15  ;;  %v2534_v15 = vor.u32 %v3044_v1, %v2533_v0 }
  0x92   :  { %1482 = vmatpush.bf16.msrb.mxu2 %v2294_v26  ;;  %v2090_v26 = vor.u32 %v2930_v18, %v2087_v19  ;;  %v3070_v17 = vld [vmem:[#allocation5 + $0x4ec] sm:$0xf]  ;;  %v2647_v18 = vld [vmem:[#allocation5 + $0x4f8] sm:$0xf0]  ;;  %v2662_v19 = vor.u32 %v3076_v5, %v2661_v4 }
  0x93   :  { %1496 = vmatpush.bf16.msrb.mxu3 %v2422_v30  ;;  %v2218_v30 = vor.u32 %v2962_v20, %v2215_v21  ;;  %v2026_v20 = vor.u32 %v2914_v7, %v2023_v9  ;;  %v3102_v21 = vld [vmem:[#allocation5 + $0x5ec] sm:$0xf]  ;;  %v2650_v28 = vor.u32 %v3070_v17, %v2647_v18  ;;  %v2455_v7 = vld [vmem:[#allocation5 + $0x378] sm:$0xf0] }
  0x94   :  { %v3022_v4 = vld [vmem:[#allocation5 + $0x36c] sm:$0xf]  ;;  %v2583_v9 = vld [vmem:[#allocation5 + $0x478] sm:$0xf0] }
  0x95   :  { %1455 = vmatpush.bf16.msrb.mxu0 %v2022_v38  ;;  %1469 = vmatpush.bf16.msrb.mxu1 %v2150_v43  ;;  %v2710_v38 = vor.u32 %v3088_v31, %v2709_v29  ;;  %v2693_v43 = vld [vmem:[#allocation5 + $0x548] sm:$0xf]  ;;  %v3002_v29 = vld [vmem:[#allocation5 + $0x2cc] sm:$0xf] }
  0x96   :  { %1483 = vmatpush.bf16.msrb.mxu2 %v2278_v44  ;;  %v2202_v44 = vor.u32 %v2958_v34, %v2199_v36  ;;  %v2694_v51 = vor.u32 %v3084_v45, %v2693_v43  ;;  %v3034_v31 = vld [vmem:[#allocation5 + $0x3cc] sm:$0xf]  ;;  %v2631_v36 = vld [vmem:[#allocation5 + $0x4d8] sm:$0xf0] }
  0x97   :  { %1497 = vmatpush.bf16.msrb.mxu3 %v2406_v47  ;;  %v2055_v47 = vld [vmem:[#allocation5 + $0x58] sm:$0xf0]  ;;  %v3066_v34 = vld [vmem:[#allocation5 + $0x4cc] sm:$0xf] }
  0x98   :  { %1456 = vmatmul.bf16.vlgmr.msrb.gmra.mxu0 %v3342_v57  ;;  %1470 = vmatmul.bf16.vlgmr.msrb.gmra.mxu1 %v3345_v6  ;;  %v2058_v52 = vor.u32 %v2922_v46, %v2055_v47  ;;  %v2998_v43 = vld [vmem:[#allocation5 + $0x2ac] sm:$0xf]  ;;  %v2487_v47 = vld [vmem:[#allocation5 + $0x3b8] sm:$0xf0] }
  0x99   :  { %1504 = vmatpush.bf16.msra.mxu0 %v2646_v48  ;;  %1518 = vmatpush.bf16.msra.mxu1 %v2774_v49  ;;  %v2954_v48 = vld [vmem:[#allocation5 + $0x14c] sm:$0xf]  ;;  %v2183_v49 = vld [vmem:[#allocation5 + $0x158] sm:$0xf0] }
  0x9a   :  { %1532 = vmatpush.bf16.msra.mxu2 %v2138_v50  ;;  %1498 = vmatmul.bf16.vlgmr.msrb.gmra.mxu3 %v3350_v23  ;;  %v2566_v50 = vor.u32 %v3052_v42, %v2565_v41  ;;  %v2186_v56 = vor.u32 %v2954_v48, %v2183_v49  ;;  %v2506_v41 = vor.u32 %v3034_v31, %v2503_v33  ;;  %v3030_v45 = vld [vmem:[#allocation5 + $0x3ac] sm:$0xf]  ;;  %v2615_v49 = vld [vmem:[#allocation5 + $0x4b8] sm:$0xf0] }
  0x9b   :  { %1546 = vmatpush.bf16.msra.mxu3 %v2266_v54  ;;  %1484 = vmatmul.bf16.vlgmr.msrb.gmra.mxu2 %v3348_v22  ;;  %v3048_v54 = vld [vmem:[#allocation5 + $0x434] sm:$0xf0]  ;;  %v2634_v42 = vor.u32 %v3066_v34, %v2631_v36  ;;  %v3062_v48 = vld [vmem:[#allocation5 + $0x4ac] sm:$0xf]  ;;  %v2295_v31 = vld [vmem:[#allocation5 + $0x238] sm:$0xf0] }
  0x9c   :  { %v3018_v17 = vld [vmem:[#allocation5 + $0x34c] sm:$0xf]  ;;  %v2423_v34 = vld [vmem:[#allocation5 + $0x338] sm:$0xf0] }
  0x9d   :  { %1505 = vmatpush.bf16.msra.mxu0 %v2630_v61  ;;  %1519 = vmatpush.bf16.msra.mxu1 %v2758_v62  ;;  %v2950_v61 = vld [vmem:[#allocation5 + $0x12c] sm:$0xf]  ;;  %v2167_v62 = vld [vmem:[#allocation5 + $0x138] sm:$0xf0] }
  0x9e   :  { %1533 = vmatpush.bf16.msra.mxu2 %v2122_v63  ;;  %v2550_v63 = vor.u32 %v3048_v54, %v2549_v53  ;;  %v2170_v8 = vor.u32 %v2950_v61, %v2167_v62  ;;  %v2490_v53 = vor.u32 %v3030_v45, %v2487_v47  ;;  %v2618_v54 = vor.u32 %v3062_v48, %v2615_v49  ;;  %v3058_v61 = vld [vmem:[#allocation5 + $0x48c] sm:$0xf]  ;;  %v2599_v62 = vld [vmem:[#allocation5 + $0x498] sm:$0xf0] }
  0x9f   :  { %1547 = vmatpush.bf16.msra.mxu3 %v2250_v3  ;;  %v2042_v3 = vor.u32 %v2918_v59, %v2039_v60  ;;  %v2471_v60 = vld [vmem:[#allocation5 + $0x398] sm:$0xf0]  ;;  %v3046_v36 = vld [vmem:[#allocation5 + $0x42c] sm:$0xf] }
  0xa0   :  { %v2474_v1 = vor.u32 %v3026_v58, %v2471_v60  ;;  %v2978_v45 = vld [vmem:[#allocation5 + $0x20c] sm:$0xf]  ;;  %v2407_v49 = vld [vmem:[#allocation5 + $0x318] sm:$0xf0] }
  0xa1   :  { %1506 = vmatpush.bf16.msra.mxu0 %v2614_v10  ;;  %1520 = vmatpush.bf16.msra.mxu1 %v2742_v11  ;;  %v2946_v10 = vld [vmem:[#allocation5 + $0x10c] sm:$0xf]  ;;  %v2151_v11 = vld [vmem:[#allocation5 + $0x118] sm:$0xf0] }
  0xa2   :  { %1534 = vmatpush.bf16.msra.mxu2 %v2106_v12  ;;  %v3006_v12 = vld [vmem:[#allocation5 + $0x2ec] sm:$0xf]  ;;  %v3112_v60 = vld [vmem:[#allocation8 + $0x38] sm:$0xff] }
  0xa3   :  { %1548 = vmatpush.bf16.msra.mxu3 %v2234_v16  ;;  %v2519_v16 = vld [vmem:[#allocation5 + $0x3f8] sm:$0xf0]  ;;  %v3010_v47 = vld [vmem:[#allocation5 + $0x30c] sm:$0xf] }
  0xa4   :  { %v2522_v27 = vor.u32 %v3038_v14, %v2519_v16  ;;  %v2311_v16 = vld [vmem:[#allocation5 + $0x258] sm:$0xf0] }
  0xa5   :  { %1507 = vmatpush.bf16.msra.mxu0 %v2598_v24  ;;  %1521 = vmatpush.bf16.msra.mxu1 %v2726_v25  ;;  %v2775_v24 = vld [vmem:[#allocation5 + $0x5f8] sm:$0xf0]  ;;  %v2154_v25 = vor.u32 %v2946_v10, %v2151_v11  ;;  %v3086_v10 = vld [vmem:[#allocation5 + $0x56c] sm:$0xf] }
  0xa6   :  { %1535 = vmatpush.bf16.msra.mxu2 %v2090_v26  ;;  %v2394_v26 = vor.u32 %v3006_v12, %v2391_v13  ;;  %v2778_v32 = vor.u32 %v3102_v21, %v2775_v24  ;;  %v2711_v11 = vld [vmem:[#allocation5 + $0x578] sm:$0xf0]  ;;  %v2458_v13 = vor.u32 %v3022_v4, %v2455_v7  ;;  %v3082_v24 = vld [vmem:[#allocation5 + $0x54c] sm:$0xf]  ;;  %v3119_v4 = vld [vmem:[#allocation8 + $0x70] sm:$0xff] }
  0xa7   :  { %1549 = vmatpush.bf16.msra.mxu3 %v2218_v30  ;;  %v2375_v30 = vld [vmem:[#allocation5 + $0x2d8] sm:$0xf0]  ;;  %v2714_v18 = vor.u32 %v3086_v10, %v2711_v11  ;;  %v3118_v10 = vld [vmem:[#allocation8 + $0x68] sm:$0xff] }
  0xa8   :  { %v2567_v21 = vld [vmem:[#allocation5 + $0x458] sm:$0xf0] }
  0xa9   :  { %1508 = vmatpush.bf16.msra.mxu0 %v2582_v37  ;;  %1522 = vmatpush.bf16.msra.mxu1 %v2710_v38  ;;  %v3098_v37 = vld [vmem:[#allocation5 + $0x5cc] sm:$0xf]  ;;  %v2759_v38 = vld [vmem:[#allocation5 + $0x5d8] sm:$0xf0] }
  0xaa   :  { %1536 = vmatpush.bf16.msra.mxu2 %v2074_v40  ;;  %v2378_v40 = vor.u32 %v3002_v29, %v2375_v30  ;;  %v2762_v46 = vor.u32 %v3098_v37, %v2759_v38  ;;  %v2982_v30 = vld [vmem:[#allocation5 + $0x22c] sm:$0xf]  ;;  %v2551_v37 = vld [vmem:[#allocation5 + $0x438] sm:$0xf0] }
  0xab   :  { %1550 = vmatpush.bf16.msra.mxu3 %v2202_v44  ;;  %v2359_v44 = vld [vmem:[#allocation5 + $0x2b8] sm:$0xf0] }
  0xad   :  { %1509 = vmatpush.bf16.msra.mxu0 %v2566_v50  ;;  %1523 = vmatpush.bf16.msra.mxu1 %v2694_v51  ;;  %v3094_v50 = vld [vmem:[#allocation5 + $0x5ac] sm:$0xf]  ;;  %v2743_v51 = vld [vmem:[#allocation5 + $0x5b8] sm:$0xf0] }
  0xae   :  { %1537 = vmatpush.bf16.msra.mxu2 %v2058_v52  ;;  %v2362_v52 = vor.u32 %v2998_v43, %v2359_v44  ;;  %v2746_v59 = vor.u32 %v3094_v50, %v2743_v51  ;;  %v2554_v44 = vor.u32 %v3046_v36, %v2551_v37  ;;  %v3042_v50 = vld [vmem:[#allocation5 + $0x40c] sm:$0xf]  ;;  %v2535_v51 = vld [vmem:[#allocation5 + $0x418] sm:$0xf0]  ;;  %v3113_v36 = vld [vmem:[#allocation8 + $0x40] sm:$0xff] }
  0xaf   :  { %1551 = vmatpush.bf16.msra.mxu3 %v2186_v56  ;;  %v2343_v56 = vld [vmem:[#allocation5 + $0x298] sm:$0xf0]  ;;  %v2538_v58 = vor.u32 %v3042_v50, %v2535_v51 }
  0xb0   :  { %v2346_v0 = vor.u32 %v2994_v55, %v2343_v56  ;;  %v2410_v56 = vor.u32 %v3010_v47, %v2407_v49 }
  0xb1   :  { %1510 = vmatpush.bf16.msra.mxu0 %v2550_v63  ;;  %1524 = vmatpush.bf16.msra.mxu1 %v2678_v2  ;;  %v3090_v63 = vld [vmem:[#allocation5 + $0x58c] sm:$0xf] }
  0xb2   :  { %1538 = vmatpush.bf16.msra.mxu2 %v2042_v3  ;;  %v2990_v2 = vld [vmem:[#allocation5 + $0x26c] sm:$0xf]  ;;  %v2327_v3 = vld [vmem:[#allocation5 + $0x278] sm:$0xf0] }
  0xb3   :  { %1552 = vmatpush.bf16.msra.mxu3 %v2170_v8  ;;  %v3054_v8 = vld [vmem:[#allocation5 + $0x46c] sm:$0xf]  ;;  %v2330_v12 = vor.u32 %v2990_v2, %v2327_v3 }
  0xb4   :  { %v2586_v14 = vor.u32 %v3054_v8, %v2583_v9 }
  0xb5   :  { %1511 = vmatpush.bf16.msra.mxu0 %v2534_v15  ;;  %1525 = vmatpush.bf16.msra.mxu1 %v2662_v19  ;;  %v2986_v15 = vld [vmem:[#allocation5 + $0x24c] sm:$0xf]  ;;  %v2439_v19 = vld [vmem:[#allocation5 + $0x358] sm:$0xf0]  ;;  %v1303_v38 = vpop.f32.mrf.mxu1 }
  0xb6   :  { %1539 = vmatpush.bf16.msra.mxu2 %v2026_v20  ;;  %v3050_v20 = vld [vmem:[#allocation5 + $0x44c] sm:$0xf] }
  0xb7   :  { %1553 = vmatpush.bf16.msra.mxu3 %v2154_v25  ;;  %v2695_v25 = vld [vmem:[#allocation5 + $0x558] sm:$0xf0] }
  0xb8   :  { %1512 = vmatmul.bf16.vlgmr.msra.gmra.mxu0 %v3354_v35  ;;  %1526 = vmatmul.bf16.vlgmr.msra.gmra.mxu1 %v3356_v39  ;;  %v2698_v33 = vor.u32 %v3082_v24, %v2695_v25  ;;  %v3115_v24 = vld [vmem:[#allocation8 + $0x50] sm:$0xff] }
  0xb9   :  { %1560 = vmatpush.bf16.msrb.mxu0 %v2394_v26  ;;  %1574 = vmatpush.bf16.msrb.mxu1 %v2522_v27  ;;  %v2314_v26 = vor.u32 %v2986_v15, %v2311_v16  ;;  %v2442_v27 = vor.u32 %v3018_v17, %v2439_v19  ;;  %v1289_v29 = vpop.f32.mrf.mxu0  ;;  %v3117_v15 = vld [vmem:[#allocation8 + $0x60] sm:$0xff]  ;;  %v3107_v19 = vld [vmem:[#allocation8 + $0x10] sm:$0xff] }
  0xba   :  { %1588 = vmatpush.bf16.msrb.mxu2 %v2650_v28  ;;  %1554 = vmatmul.bf16.vlgmr.msra.gmra.mxu3 %v3345_v6  ;;  %v2602_v6 = vor.u32 %v3058_v61, %v2599_v62  ;;  %v2570_v28 = vor.u32 %v3050_v20, %v2567_v21 }
  0xbb   :  { %1602 = vmatpush.bf16.msrb.mxu3 %v2778_v32  ;;  %1540 = vmatmul.bf16.vlgmr.msra.gmra.mxu2 %v3342_v57  ;;  %v2727_v57 = vld [vmem:[#allocation5 + $0x598] sm:$0xf0]  ;;  %v3014_v32 = vld [vmem:[#allocation5 + $0x32c] sm:$0xf] }
  0xbc   :  { %v2730_v5 = vor.u32 %v3090_v63, %v2727_v57  ;;  %v2426_v43 = vor.u32 %v3014_v32, %v2423_v34 }
  0xbd   :  { %1561 = vmatpush.bf16.msrb.mxu0 %v2378_v40  ;;  %1575 = vmatpush.bf16.msrb.mxu1 %v2506_v41  ;;  %v3078_v40 = vld [vmem:[#allocation5 + $0x52c] sm:$0xf]  ;;  %v2679_v41 = vld [vmem:[#allocation5 + $0x538] sm:$0xf0]  ;;  %v1305_v57 = vpop.f32.mrf.mxu1 }
  0xbe   :  { %1589 = vmatpush.bf16.msrb.mxu2 %v2634_v42  ;;  %v2298_v42 = vor.u32 %v2982_v30, %v2295_v31  ;;  %v2682_v48 = vor.u32 %v3078_v40, %v2679_v41  ;;  %v3105_v30 = vld [vmem:[#allocation8] sm:$0xff] }
  0xbf   :  { %1603 = vmatpush.bf16.msrb.mxu3 %v2762_v46  ;;  %v2279_v46 = vld [vmem:[#allocation5 + $0x218] sm:$0xf0] }
  0xc0   :  { %v2282_v55 = vor.u32 %v2978_v45, %v2279_v46  ;;  %v3128_v46 = vld [vmem:[#allocation8 + $0xb8] sm:$0xff] }
  0xc1   :  { %1562 = vmatpush.bf16.msrb.mxu0 %v2362_v52  ;;  %1576 = vmatpush.bf16.msrb.mxu1 %v2490_v53  ;;  %v3074_v52 = vld [vmem:[#allocation5 + $0x50c] sm:$0xf]  ;;  %v2663_v53 = vld [vmem:[#allocation5 + $0x518] sm:$0xf0]  ;;  %v1291_v63 = vpop.f32.mrf.mxu0 }
  0xc2   :  { %1590 = vmatpush.bf16.msrb.mxu2 %v2618_v54  ;;  %v3374_v54 = vld [vmem:[#allocation7] sm:$0xf] }
  0xc3   :  { %1604 = vmatpush.bf16.msrb.mxu3 %v2746_v59  ;;  %v2666_v59 = vor.u32 %v3074_v52, %v2663_v53  ;;  %v282_v62 = vperm.slane %v3374_v54, 0 }
  0xc5   :  { %1563 = vmatpush.bf16.msrb.mxu0 %v2346_v0  ;;  %1577 = vmatpush.bf16.msrb.mxu1 %v2474_v1  ;;  %v3120_v0 = vld [vmem:[#allocation8 + $0x78] sm:$0xff]  ;;  %v3111_v1 = vld [vmem:[#allocation8 + $0x30] sm:$0xff]  ;;  %v1290_v2 = vadd.f32 %v1289_v29, %v282_v62  ;;  %v1292_v3 = vadd.f32 %v1291_v63, %v282_v62  ;;  %v3114_v29 = vld [vmem:[#allocation8 + $0x48] sm:$0xff] }
  0xc6   :  { %1591 = vmatpush.bf16.msrb.mxu2 %v2602_v6  ;;  %v1317_v61 = vpop.f32.mrf.mxu2  ;;  %v1331_v6 = vpop.f32.mrf.mxu3 }
  0xc7   :  { %1605 = vmatpush.bf16.msrb.mxu3 %v2730_v5  ;;  %v3110_v5 = vld [vmem:[#allocation8 + $0x28] sm:$0xff]  ;;  %v1304_v7 = vadd.f32 %v1303_v38, %v1290_v2  ;;  %v1306_v8 = vadd.f32 %v1305_v57, %v1292_v3  ;;  %v283_v38 = vperm.slane %v3374_v54, 1 }
  0xc9   :  { %1564 = vmatpush.bf16.msrb.mxu0 %v2330_v12  ;;  %1578 = vmatpush.bf16.msrb.mxu1 %v2458_v13  ;;  %v3109_v12 = vld [vmem:[#allocation8 + $0x20] sm:$0xff]  ;;  %v1318_v13 = vadd.f32 %v1317_v61, %v1304_v7  ;;  %v3123_v7 = vld [vmem:[#allocation8 + $0x90] sm:$0xff] }
  0xca   :  { %1592 = vmatpush.bf16.msrb.mxu2 %v2586_v14 }
  0xcb   :  { %1606 = vmatpush.bf16.msrb.mxu3 %v2714_v18  ;;  %v1332_v16 = vadd.f32 %v1331_v6, %v1318_v13  ;;  %v3116_v18 = vld [vmem:[#allocation8 + $0x58] sm:$0xff] }
  0xcd   :  { %1565 = vmatpush.bf16.msrb.mxu0 %v2314_v26  ;;  %1579 = vmatpush.bf16.msrb.mxu1 %v2442_v27  ;;  %v3106_v26 = vld [vmem:[#allocation8 + $0x8] sm:$0xff] }
  0xce   :  { %1593 = vmatpush.bf16.msrb.mxu2 %v2570_v28  ;;  %v1319_v9 = vpop.f32.mrf.mxu2 }
  0xcf   :  { %1607 = vmatpush.bf16.msrb.mxu3 %v2698_v33  ;;  %v1320_v14 = vadd.f32 %v1319_v9, %v1306_v8  ;;  %v3122_v8 = vld [vmem:[#allocation8 + $0x88] sm:$0xff] }
  0xd1   :  { %1566 = vmatpush.bf16.msrb.mxu0 %v2298_v42  ;;  %1580 = vmatpush.bf16.msrb.mxu1 %v2426_v43 }
  0xd2   :  { %1594 = vmatpush.bf16.msrb.mxu2 %v2554_v44 }
  0xd3   :  { %1608 = vmatpush.bf16.msrb.mxu3 %v2682_v48  ;;  %v3127_v48 = vld [vmem:[#allocation8 + $0xb0] sm:$0xff] }
  0xd5   :  { %1567 = vmatpush.bf16.msrb.mxu0 %v2282_v55  ;;  %1581 = vmatpush.bf16.msrb.mxu1 %v2410_v56  ;;  %v1345_v11 = vpop.f32.mrf.mxu0  ;;  %v3126_v56 = vld [vmem:[#allocation8 + $0xa8] sm:$0xff] }
  0xd6   :  { %1595 = vmatpush.bf16.msrb.mxu2 %v2538_v58  ;;  %v1346_v20 = vadd.f32 %v1345_v11, %v1332_v16  ;;  %v3121_v11 = vld [vmem:[#allocation8 + $0x80] sm:$0xff] }
  0xd7   :  { %1609 = vmatpush.bf16.msrb.mxu3 %v2666_v59 }
  0xd8   :  { %1568 = vmatmul.bf16.vlgmr.msrb.gmra.mxu0 %v3348_v22  ;;  %1582 = vmatmul.bf16.vlgmr.msrb.gmra.mxu1 %v3350_v23  ;;  %v1359_v22 = vpop.f32.mrf.mxu1  ;;  %v1333_v23 = vpop.f32.mrf.mxu3 }
  0xd9   :  { %1888 = vmatpush.bf16.msra.mxu0 %v3112_v60  ;;  %1902 = vmatpush.bf16.msra.mxu1 %v3120_v0  ;;  %v1360_v27 = vadd.f32 %v1359_v22, %v1346_v20  ;;  %v3125_v60 = vld [vmem:[#allocation8 + $0xa0] sm:$0xff]  ;;  %v3136_v22 = vld [vmem:[#allocation8 + $0xf8] sm:$0xff]  ;;  %v3134_v20 = vld [vmem:[#allocation8 + $0xe8] sm:$0xff] }
  0xda   :  { %1596 = vmatmul.bf16.vlgmr.msrb.gmra.mxu2 %v3354_v35  ;;  %1610 = vmatmul.bf16.vlgmr.msrb.gmra.mxu3 %v3356_v39  ;;  %v3108_v35 = vld [vmem:[#allocation8 + $0x18] sm:$0xff]  ;;  %v1334_v39 = vadd.f32 %v1333_v23, %v1320_v14 }
  0xdb   :  { %v1616_v32 = vmax.f32 %v1360_v27, 0.0  ;;  %1916 = vmatpush.bf16.msra.mxu2 %v3128_v46  ;;  %1930 = vmatpush.bf16.msra.mxu3 %v3136_v22 }
  0xdd   :  { %1889 = vmatpush.bf16.msra.mxu0 %v3111_v1  ;;  %1903 = vmatpush.bf16.msra.mxu1 %v3119_v4  ;;  %v1347_v17 = vpop.f32.mrf.mxu0 }
  0xde   :  { %v1348_v21 = vadd.f32 %v1347_v17, %v1334_v39  ;;  %v1373_v31 = vpop.f32.mrf.mxu2 }
  0xdf   :  { %v1374_v40 = vadd.f32 %v1373_v31, %v283_v38  ;;  %1917 = vmatpush.bf16.msra.mxu2 %v3127_v48  ;;  %v285_v48 = vperm.slane %v3374_v54, 3 }
  0xe0   :  { %v1361_v25 = vpop.f32.mrf.mxu1  ;;  %v1387_v34 = vpop.f32.mrf.mxu3 }
  0xe1   :  { %1890 = vmatpush.bf16.msra.mxu0 %v3110_v5  ;;  %1904 = vmatpush.bf16.msra.mxu1 %v3118_v10  ;;  %v1362_v28 = vadd.f32 %v1361_v25, %v1348_v21  ;;  %v1388_v43 = vadd.f32 %v1387_v34, %v1374_v40  ;;  %v3124_v5 = vld [vmem:[#allocation8 + $0x98] sm:$0xff] }
  0xe3   :  { %v1620_v33 = vmax.f32 %v1362_v28, 0.0  ;;  %1918 = vmatpush.bf16.msra.mxu2 %v3126_v56 }
  0xe5   :  { %1891 = vmatpush.bf16.msra.mxu0 %v3109_v12  ;;  %1905 = vmatpush.bf16.msra.mxu1 %v3117_v15  ;;  %v1624_v37 = vpack.c.bf16 %v1620_v33, %v1616_v32  ;;  %v284_v12 = vperm.slane %v3374_v54, 2  ;;  %v3135_v15 = vld [vmem:[#allocation8 + $0xf0] sm:$0xff]  ;;  %v3132_v32 = vld [vmem:[#allocation8 + $0xd8] sm:$0xff] }
  0xe6   :  { %v1375_v41 = vpop.f32.mrf.mxu2  ;;  %1931 = vmatpush.bf16.msra.mxu3 %v3135_v15 }
  0xe7   :  { %v1376_v47 = vadd.f32 %v1375_v41, %v283_v38  ;;  %1919 = vmatpush.bf16.msra.mxu2 %v3125_v60  ;;  %v3131_v38 = vld [vmem:[#allocation8 + $0xd0] sm:$0xff] }
  0xe8   :  { %v1389_v42 = vpop.f32.mrf.mxu3 }
  0xe9   :  { %1892 = vmatpush.bf16.msra.mxu0 %v3108_v35  ;;  %1906 = vmatpush.bf16.msra.mxu1 %v3116_v18  ;;  %v1390_v50 = vadd.f32 %v1389_v42, %v1376_v47 }
  0xea   :  { %1932 = vmatpush.bf16.msra.mxu3 %v3134_v20 }
  0xeb   :  { %1920 = vmatpush.bf16.msra.mxu2 %v3124_v5 }
  0xed   :  { %1893 = vmatpush.bf16.msra.mxu0 %v3107_v19  ;;  %1907 = vmatpush.bf16.msra.mxu1 %v3115_v24 }
  0xef   :  { %1921 = vmatpush.bf16.msra.mxu2 %v3123_v7 }
  0xf1   :  { %1894 = vmatpush.bf16.msra.mxu0 %v3106_v26  ;;  %1908 = vmatpush.bf16.msra.mxu1 %v3114_v29  ;;  %v3133_v26 = vld [vmem:[#allocation8 + $0xe0] sm:$0xff] }
  0xf2   :  { %1933 = vmatpush.bf16.msra.mxu3 %v3133_v26 }
  0xf3   :  { %1922 = vmatpush.bf16.msra.mxu2 %v3122_v8 }
  0xf5   :  { %1895 = vmatpush.bf16.msra.mxu0 %v3105_v30  ;;  %1909 = vmatpush.bf16.msra.mxu1 %v3113_v36  ;;  %v1401_v44 = vpop.f32.mrf.mxu0  ;;  %v1415_v45 = vpop.f32.mrf.mxu1 }
  0xf6   :  { %v1402_v49 = vadd.f32 %v1401_v44, %v1388_v43  ;;  %1934 = vmatpush.bf16.msra.mxu3 %v3132_v32  ;;  %v3130_v43 = vld [vmem:[#allocation8 + $0xc8] sm:$0xff] }
  0xf7   :  { %1923 = vmatpush.bf16.msra.mxu2 %v3121_v11  ;;  %v3150_v11 = vld [vmem:[%s3394_s4] ss:$0 sm:$0xff]  ;;  %s3297_s4 = smov [#allocation10]  }
  0xf8   :  { %1896 = vmatmul.bf16.vlgmr.msra.gmra.mxu0 %v1624_v37  ;;  %v1416_v52 = vadd.f32 %v1415_v45, %v1402_v49  ;;  %v3129_v45 = vld [vmem:[#allocation8 + $0xc0] sm:$0xff]  ;;  %s1970_s17 = sshll.u32 %s3297_s4, 4  ;;  %s1971_s17 = int_to_ptr.vmem [resolvable:$true] %s1970_s17 }
  0xfa   :  { %1935 = vmatpush.bf16.msra.mxu3 %v3131_v38 }
  0xfd   :  { %v1403_v53 = vpop.f32.mrf.mxu0  ;;  %v1443_v55 = vpop.f32.mrf.mxu3 }
  0xfe   :  { %v1429_v51 = vpop.f32.mrf.mxu2  ;;  %v1404_v58 = vadd.f32 %v1403_v53, %v1390_v50  ;;  %v1417_v59 = vpop.f32.mrf.mxu1  ;;  %1936 = vmatpush.bf16.msra.mxu3 %v3130_v43 }
  0xff   :  { %v1430_v61 = vadd.f32 %v1429_v51, %v1416_v52 }
 0x100   :  { %v1418_v62 = vadd.f32 %v1417_v59, %v1404_v58 }
 0x101   :  { %v1444_v57 = vadd.f32 %v1443_v55, %v1430_v61 }
 0x102   :  { %1937 = vmatpush.bf16.msra.mxu3 %v3129_v45 }
 0x103   :  { %v1617_v2 = vmax.f32 %v1444_v57, 0.0 }
 0x105   :  { %v1445_v1 = vpop.f32.mrf.mxu3 }
 0x106   :  { %v1431_v63 = vpop.f32.mrf.mxu2 }
 0x107   :  { %v1432_v0 = vadd.f32 %v1431_v63, %v1418_v62 }
 0x109   :  { %v1446_v6 = vadd.f32 %v1445_v1, %v1432_v0 }
 0x10b   :  { %v1621_v3 = vmax.f32 %v1446_v6, 0.0 }
 0x10d   :  { %v1625_v4 = vpack.c.bf16 %v1621_v3, %v1617_v2 }
 0x10f   :  { %1910 = vmatmul.bf16.vlgmr.msra.gmra.mxu1 %v1625_v4 }
 0x115   :  { %v1457_v9 = vpop.f32.mrf.mxu0  ;;  %v1471_v10 = vpop.f32.mrf.mxu1 }
 0x116   :  { %v1458_v13 = vadd.f32 %v1457_v9, %v284_v12 }
 0x118   :  { %v1472_v35 = vadd.f32 %v1471_v10, %v1458_v13 }
 0x11d   :  { %v1459_v23 = vpop.f32.mrf.mxu0  ;;  %v1473_v16 = vpop.f32.mrf.mxu1 }
 0x11e   :  { %v1485_v14 = vpop.f32.mrf.mxu2  ;;  %v1499_v39 = vpop.f32.mrf.mxu3  ;;  %v1460_v17 = vadd.f32 %v1459_v23, %v284_v12 }
 0x11f   :  { %v1486_v18 = vadd.f32 %v1485_v14, %v1472_v35 }
 0x120   :  { %v1474_v19 = vadd.f32 %v1473_v16, %v1460_v17 }
 0x121   :  { %v1500_v24 = vadd.f32 %v1499_v39, %v1486_v18 }
 0x126   :  { %v1487_v21 = vpop.f32.mrf.mxu2  ;;  %v1501_v29 = vpop.f32.mrf.mxu3 }
 0x127   :  { %v1488_v28 = vadd.f32 %v1487_v21, %v1474_v19 }
 0x129   :  { %v1502_v31 = vadd.f32 %v1501_v29, %v1488_v28 }
 0x135   :  { %v1513_v25 = vpop.f32.mrf.mxu0  ;;  %v1527_v27 = vpop.f32.mrf.mxu1 }
 0x136   :  { %v1514_v30 = vadd.f32 %v1513_v25, %v1500_v24 }
 0x138   :  { %v1528_v33 = vadd.f32 %v1527_v27, %v1514_v30 }
 0x13a   :  { %v1618_v40 = vmax.f32 %v1528_v33, 0.0 }
 0x13d   :  { %v1515_v34 = vpop.f32.mrf.mxu0  ;;  %v1529_v37 = vpop.f32.mrf.mxu1 }
 0x13e   :  { %v1516_v36 = vadd.f32 %v1515_v34, %v1502_v31  ;;  %v1541_v46 = vpop.f32.mrf.mxu2  ;;  %v1555_v47 = vpop.f32.mrf.mxu3 }
 0x13f   :  { %v1542_v50 = vadd.f32 %v1541_v46, %v285_v48 }
 0x140   :  { %v1530_v41 = vadd.f32 %v1529_v37, %v1516_v36 }
 0x141   :  { %v1556_v55 = vadd.f32 %v1555_v47, %v1542_v50 }
 0x142   :  { %v1622_v42 = vmax.f32 %v1530_v41, 0.0 }
 0x144   :  { %v1626_v44 = vpack.c.bf16 %v1622_v42, %v1618_v40 }
 0x146   :  { %1924 = vmatmul.bf16.vlgmr.msra.gmra.mxu2 %v1626_v44  ;;  %v1543_v49 = vpop.f32.mrf.mxu2  ;;  %v1557_v51 = vpop.f32.mrf.mxu3 }
 0x147   :  { %v1544_v56 = vadd.f32 %v1543_v49, %v285_v48 }
 0x149   :  { %v1558_v60 = vadd.f32 %v1557_v51, %v1544_v56 }
 0x155   :  { %v1569_v52 = vpop.f32.mrf.mxu0  ;;  %v1583_v53 = vpop.f32.mrf.mxu1 }
 0x156   :  { %v1570_v58 = vadd.f32 %v1569_v52, %v1556_v55 }
 0x158   :  { %v1584_v63 = vadd.f32 %v1583_v53, %v1570_v58 }
 0x15d   :  { %v1597_v59 = vpop.f32.mrf.mxu2  ;;  %v1611_v61 = vpop.f32.mrf.mxu3 }
 0x15e   :  { %v1571_v62 = vpop.f32.mrf.mxu0  ;;  %v1598_v0 = vadd.f32 %v1597_v59, %v1584_v63  ;;  %v1585_v1 = vpop.f32.mrf.mxu1 }
 0x15f   :  { %v1572_v57 = vadd.f32 %v1571_v62, %v1558_v60 }
 0x160   :  { %v1612_v3 = vadd.f32 %v1611_v61, %v1598_v0 }
 0x161   :  { %v1586_v6 = vadd.f32 %v1585_v1, %v1572_v57 }
 0x162   :  { %v1619_v7 = vmax.f32 %v1612_v3, 0.0 }
 0x165   :  { %v1599_v2 = vpop.f32.mrf.mxu2  ;;  %v1613_v4 = vpop.f32.mrf.mxu3 }
 0x166   :  { %v1600_v54 = vadd.f32 %v1599_v2, %v1586_v6 }
 0x168   :  { %v1614_v5 = vadd.f32 %v1613_v4, %v1600_v54 }
 0x16a   :  { %v1623_v8 = vmax.f32 %v1614_v5, 0.0 }
 0x16c   :  { %v1627_v9 = vpack.c.bf16 %v1623_v8, %v1619_v7 }
 0x16e   :  { %1938 = vmatmul.bf16.vlgmr.msra.gmra.mxu3 %v1627_v9 }
 0x175   :  { %v1897_v10 = vpop.f32.mrf.mxu0 }
 0x176   :  { %v1898_v13 = vadd.f32 %v3150_v11, %v1897_v10 }
 0x17d   :  { %v1899_v23 = vpop.f32.mrf.mxu0 }
 0x17e   :  { %v1900_v17 = vadd.f32 %v3150_v11, %v1899_v23 }
 0x18c   :  { %v1911_v12 = vpop.f32.mrf.mxu1 }
 0x18d   :  { %v1912_v14 = vadd.f32 %v1911_v12, %v1898_v13 }
 0x194   :  { %v1913_v39 = vpop.f32.mrf.mxu1 }
 0x195   :  { %v1914_v19 = vadd.f32 %v1913_v39, %v1900_v17 }
 0x1c9   :  { %v1925_v22 = vpop.f32.mrf.mxu2 }
 0x1ca   :  { %v1926_v15 = vadd.f32 %v1925_v22, %v1912_v14 }
 0x1d1   :  { %v1927_v18 = vpop.f32.mrf.mxu2 }
 0x1d2   :  { %v1928_v20 = vadd.f32 %v1927_v18, %v1914_v19 }
 0x1f1   :  { %v1939_v35 = vpop.f32.mrf.mxu3 }
 0x1f2   :  { %v1940_v16 = vadd.f32 %v1939_v35, %v1926_v15 }
 0x1f4   :  { %1944 = vmax.xlane.f32.xlu0 %v1940_v16 }
 0x1f9   :  { %v1941_v21 = vpop.f32.mrf.mxu3 }
 0x1fa   :  { %v1942_v24 = vadd.f32 %v1941_v21, %v1928_v20 }
 0x1fc   :  { %1946 = vmax.xlane.f32.xlu0 %v1942_v24 }
 0x267   :  { %v1945_v25 = vpop.xlane.xlu0 %1944 }
 0x268   :  { %v1948_v26 = vsub.f32 %v1940_v16, %v1945_v25 }
 0x26a   :  { %v1950_v27 = vmul.f32 1.442695, %v1948_v26 }
 0x26c   :  { %3151 = vpow2.f32 %v1950_v27 }
 0x26f   :  { %v1947_v28 = vpop.xlane.xlu0 %1946 }
 0x270   :  { %v1949_v29 = vsub.f32 %v1942_v24, %v1947_v28 }
 0x272   :  { %v3152_v30 = vpop.eup %3151  ;;  %v1952_v31 = vmul.f32 1.442695, %v1949_v29 }
 0x273   :  { %1954 = vadd.xlane.f32.xlu1 %v3152_v30 }
 0x274   :  { %3153 = vpow2.f32 %v1952_v31 }
 0x27a   :  { %v3154_v32 = vpop.eup %3153 }
 0x27b   :  { %1956 = vadd.xlane.f32.xlu1 %v3154_v32 }
 0x2e6   :  { %v1955_v33 = vpop.xlane.xlu1 %1954 }
 0x2e7   :  { %3155 = vlog2.f32 %v1955_v33 }
 0x2ed   :  { %v3156_v34 = vpop.eup %3155 }
 0x2ee   :  { %v1959_v36 = vmul.f32 0.6931472, %v3156_v34  ;;  %v1957_v37 = vpop.xlane.xlu1 %1956 }
 0x2ef   :  { %3157 = vlog2.f32 %v1957_v37 }
 0x2f0   :  { %v1962_v38 = vsub.f32 %v1948_v26, %v1959_v36 }
 0x2f2   :  { %1964 = vst [vmem:[#allocation10] sm:$0xff] %v1962_v38 }
 0x2f5   :  { %v3158_v40 = vpop.eup %3157 }
 0x2f6   :  { %v1961_v41 = vmul.f32 0.6931472, %v3158_v40 }
 0x2f8   :  { %v1963_v42 = vsub.f32 %v1949_v29, %v1961_v41 }
 0x2fa   :  { %1965 = vst [vmem:[#allocation10 + $0x8] sm:$0xff] %v1963_v42 }
 0x2fb   :  { %1978 = dma.vmem_to_hbm [thread:$0]  %s1971_s17, 256, %s1973_s20, [#allocation4], %s3298_s21, %s3298_s21, %s3299_s22  }
 0x2fc   :  { %3285 = dma.done.wait [#allocation4], 256  }
 0x2fd   :  { %3286 = vsyncadd [#allocation4], 4294967040 }
 0x2fe   :  { %1983 = vsyncpa [#allocation3], 1 }
 0x2ff   :  { %1984 = vsyncpa [#allocation6], 1 }
 0x300   :  { %1985 = vsyncpa [#allocation9], 1 }
 0x301   :  { %1986 = vsyncpa [#allocation4], 1 }

</bundles_post_ra>
